<compile_context>
chip_gen: v6e
topology: v6e:2x2x1
jax: 0.10.0
libtpu: 0.0.40
codegen_flags: <defaults>
</compile_context>

<pallas_src>
import functools

import jax
import jax.numpy as jnp
from jax.experimental import pallas as pl
from jax.experimental.pallas import tpu as pltpu


def _round_up(x, m):
    return ((x + m - 1) // m) * m


# ----------------------------- Pallas kernel ------------------------------- #
def monkey_head_kernel(x_ref, w1t_ref, shift_ref, w2_ref, b2_ref, o_ref, acc_ref,
                       *, bt, thw, hw, ragged):
    # x_ref    : [Bt, Cin, THW] f32   native-NCHW feature tile (spatial minor)
    # w1t_ref  : [128, Cin]     bf16  1x1-conv weight, BN scale folded (row scale)
    # shift_ref: [128, 1]       f32   folded conv-bias + BN shift
    # w2_ref   : [NCp, 128]     f32   fc weight with 1/HW folded in
    # b2_ref   : [NCp, 1]       f32   fc bias (rows >= NC are zero)
    # o_ref    : [Bt, NCp, 1]   f32   logits, one channel-major column per image
    # acc_ref  : [Bt, 128, 1]   f32   running pooled sums over spatial tiles
    t = pl.program_id(1)

    @pl.when(t == 0)
    def _():
        acc_ref[...] = jnp.zeros_like(acc_ref)

    if ragged:
        col = t * thw + jax.lax.broadcasted_iota(jnp.int32, (1, thw), 1)
        valid = col < hw                                        # [1, THW]

    for b in range(bt):                                         # static unroll, bt <= 8
        # f32 -> bf16 cast in-kernel (VPU, hidden under the DMA); MXU matmul
        # with f32 accumulation: [128, Cin] @ [Cin, THW] -> [128, THW].
        xb = x_ref[b].astype(jnp.bfloat16)
        h = jnp.dot(w1t_ref[...], xb, preferred_element_type=jnp.float32)
        h = jnp.maximum(h + shift_ref[...], 0.0)                # folded BN shift + ReLU
        if ragged:
            h = jnp.where(valid, h, 0.0)                        # zero OOB spatial columns
        acc_ref[b] += jnp.sum(h, axis=1, keepdims=True)         # partial spatial sum

    @pl.when(t == pl.num_programs(1) - 1)
    def _():
        # AdaptiveAvgPool2d(1): 1/HW is folded into w2.  Dropout = identity (eval).
        for b in range(bt):
            logits = jnp.dot(w2_ref[...], acc_ref[b],
                             preferred_element_type=jnp.float32)  # [NCp, 1]
            o_ref[b] = logits + b2_ref[...]


# ------------------------------- wrapper ------------------------------------ #
def _pick_tiling(B, HW, max_rows, max_bt=8):
    """Choose (images per step, spatial tile, #spatial tiles) under the
    Bt*THW <= max_rows VMEM budget (~5 MiB/buffer at f32, Cin=1280)."""
    if HW <= max_rows:
        thw, n_sp, bt = HW, 1, 1
        for cand in range(min(max_bt, B), 0, -1):
            # keep >= 2 batch blocks when B >= 2 so the parallel axis can use
            # both v7x TensorCores.
            if B % cand == 0 and cand * HW <= max_rows and (B // cand >= 2 or B == 1):
                bt = cand
                break
    else:
        bt = 1
        thw = max(128, (max_rows // 2) // 128 * 128)   # multiple of 128 lanes
        n_sp = pl.cdiv(HW, thw)
    return bt, thw, n_sp


@functools.partial(jax.jit, static_argnames=("max_rows",))
def monkey_head_forward(feats_nchw, params, *, max_rows=1024):
    """feats_nchw: [B, 1280, H, W] float32 — output of the EfficientNet backbone."""
    B, Cin, H, W = feats_nchw.shape
    HW = H * W

    # Fold eval-mode BatchNorm + conv bias into a per-channel scale/shift and
    # fold the scale into the 1x1-conv weight rows (kernel does w1t @ x + shift).
    eps = 1e-5
    scale = params["bn_gamma"] / jnp.sqrt(params["bn_var"] + eps)              # [128]
    shift = ((params["conv_b"] - params["bn_mean"]) * scale
             + params["bn_beta"]).reshape(128, 1).astype(jnp.float32)          # [128,1]
    w1t = (params["conv_w"].reshape(128, Cin) * scale[:, None]).astype(jnp.bfloat16)

    # fc weight with 1/HW folded in, padded to 128 output rows (sliced after).
    NC = params["fc_w"].shape[0]
    NCp = _round_up(NC, 128)
    inv_hw = 1.0 / float(HW)
    w2 = jnp.zeros((NCp, 128), jnp.float32).at[:NC].set(
        params["fc_w"].astype(jnp.float32) * inv_hw)
    b2 = jnp.zeros((NCp, 1), jnp.float32).at[:NC, 0].set(
        params["fc_b"].astype(jnp.float32))

    bt, thw, n_sp = _pick_tiling(B, HW, max_rows)
    ragged = (n_sp * thw) != HW

    # NCHW -> [B, Cin, HW]: pure reshape, no extra HBM pass.
    x = feats_nchw.reshape(B, Cin, HW)

    kernel = functools.partial(monkey_head_kernel,
                               bt=bt, thw=thw, hw=HW, ragged=ragged)

    flops = 2 * B * HW * Cin * 128 + 2 * B * 128 * NCp
    bytes_accessed = (x.size * 4 + w1t.size * 2
                      + (shift.size + w2.size + b2.size + B * NCp) * 4)

    out = pl.pallas_call(
        kernel,
        out_shape=jax.ShapeDtypeStruct((B, NCp, 1), jnp.float32),
        grid=(B // bt, n_sp),
        in_specs=[
            pl.BlockSpec((bt, Cin, thw), lambda bb, t: (bb, 0, t)),   # feature tile
            pl.BlockSpec((128, Cin), lambda bb, t: (0, 0)),           # w1t (resident)
            pl.BlockSpec((128, 1), lambda bb, t: (0, 0)),             # shift
            pl.BlockSpec((NCp, 128), lambda bb, t: (0, 0)),           # w2
            pl.BlockSpec((NCp, 1), lambda bb, t: (0, 0)),             # b2
        ],
        out_specs=pl.BlockSpec((bt, NCp, 1), lambda bb, t: (bb, 0, 0)),
        scratch_shapes=[pltpu.VMEM((bt, 128, 1), jnp.float32)],
        compiler_params=pltpu.CompilerParams(
            dimension_semantics=("parallel", "arbitrary")),
        cost_estimate=pl.CostEstimate(flops=flops, transcendentals=0,
                                      bytes_accessed=bytes_accessed),
    )(x, w1t, shift, w2, b2)

    return out[:, :NC, 0]


# ------------------------- deterministic parameters ------------------------ #
def init_params(num_classes, in_features=1280):
    key = jax.random.PRNGKey(0)
    ks = jax.random.split(key, 8)
    return {
        "conv_w": 0.02 * jax.random.normal(ks[0], (128, in_features, 1, 1), jnp.float32),
        "conv_b": 0.01 * jax.random.normal(ks[1], (128,), jnp.float32),
        "bn_gamma": 1.0 + 0.05 * jax.random.normal(ks[2], (128,), jnp.float32),
        "bn_beta": 0.05 * jax.random.normal(ks[3], (128,), jnp.float32),
        "bn_mean": 0.1 * jax.random.normal(ks[4], (128,), jnp.float32),
        "bn_var": 1.0 + 0.1 * jax.random.uniform(ks[5], (128,), jnp.float32),
        "fc_w": 0.05 * jax.random.normal(ks[6], (num_classes, 128), jnp.float32),
        "fc_b": 0.01 * jax.random.normal(ks[7], (num_classes,), jnp.float32),
    }


# ------------------------------ pure-JAX reference ------------------------- #
def reference_forward(feats_nchw, params):
    eps = 1e-5
    B, Cin, H, W = feats_nchw.shape
    w1 = params["conv_w"].reshape(128, Cin)
    y = jnp.einsum("bchw,oc->bohw", feats_nchw, w1) + params["conv_b"][None, :, None, None]
    y = (y - params["bn_mean"][None, :, None, None]) / jnp.sqrt(
        params["bn_var"][None, :, None, None] + eps)
    y = y * params["bn_gamma"][None, :, None, None] + params["bn_beta"][None, :, None, None]
    y = jnp.maximum(y, 0.0)
    y = y.mean(axis=(2, 3))                              # AdaptiveAvgPool2d(1) + flatten
    return y @ params["fc_w"].T + params["fc_b"]         # Dropout = identity (eval)


# ----------------------------------- main ----------------------------------- #
if __name__ == "__main__":
    num_classes = 10
    B, Cin = 2, 1280
    params = init_params(num_classes, in_features=Cin)
    k1, k2 = jax.random.split(jax.random.PRNGKey(0))

    # Case 1: single-spatial-tile path (typical EfficientNet-B1 regime, small HW).
    H, W = 4, 4
    feats = jax.random.normal(k1, (B, Cin, H, W), jnp.float32)
    out = jax.block_until_ready(monkey_head_forward(feats, params))
    ref = reference_forward(feats, params)
    assert out.shape == (B, num_classes), out.shape
    assert out.dtype == jnp.float32
    err = float(jnp.max(jnp.abs(out - ref)))
    # bf16 activation/weight MXU path vs f32 reference -> loosened tolerance.
    assert jnp.allclose(out, ref, atol=3e-2, rtol=3e-2), f"case1 mismatch ({err})"

    # Case 2: multi-tile ragged spatial path (exercises in-kernel tail masking).
    H2, W2 = 10, 20
    feats2 = jax.random.normal(k2, (B, Cin, H2, W2), jnp.float32)
    out2 = jax.block_until_ready(monkey_head_forward(feats2, params, max_rows=128))
    ref2 = reference_forward(feats2, params)
    err2 = float(jnp.max(jnp.abs(out2 - ref2)))
    assert jnp.allclose(out2, ref2, atol=3e-2, rtol=3e-2), f"case2 mismatch ({err2})"

    print("KERNEL_OK")
</pallas_src>

<mosaic_0001>
module attributes {stable_mosaic.version = 11 : i64} {
  func.func @monkey_head_kernel(%arg0: i32, %arg1: i32, %arg2: memref<1x1280x16xf32, #tpu.memory_space<vmem>>, %arg3: memref<128x1280xbf16, #tpu.memory_space<vmem>>, %arg4: memref<128x1xf32, #tpu.memory_space<vmem>>, %arg5: memref<128x128xf32, #tpu.memory_space<vmem>>, %arg6: memref<128x1xf32, #tpu.memory_space<vmem>>, %arg7: memref<1x128x1xf32, #tpu.memory_space<vmem>>, %arg8: memref<1x128x1xf32, #tpu.memory_space<vmem>>) attributes {dimension_semantics = [#tpu.dimension_semantics<parallel>, #tpu.dimension_semantics<arbitrary>], iteration_bounds = array<i64: 2, 1>, scalar_prefetch = 0 : i64, scratch_operands = 1 : i64, tpu.core_type = #tpu.core_type<tc>, window_params = [{transform_indices = @transform_0, window_bounds = array<i64: 1, 1280, 16>}, {pipeline_mode = #tpu.pipeline_mode<synchronous>, transform_indices = @transform_1, window_bounds = array<i64: 128, 1280>}, {pipeline_mode = #tpu.pipeline_mode<synchronous>, transform_indices = @transform_2, window_bounds = array<i64: 128, 1>}, {pipeline_mode = #tpu.pipeline_mode<synchronous>, transform_indices = @transform_3, window_bounds = array<i64: 128, 128>}, {pipeline_mode = #tpu.pipeline_mode<synchronous>, transform_indices = @transform_4, window_bounds = array<i64: 128, 1>}, {transform_indices = @transform_5, window_bounds = array<i64: 1, 128, 1>}]} {
    %c0_i32 = arith.constant 0 : i32
    %0 = arith.cmpi eq, %arg1, %c0_i32 : i32
    %1 = arith.extui %0 : i1 to i32
    %c0_i32_0 = arith.constant 0 : i32
    %2 = arith.cmpi ne, %1, %c0_i32_0 : i32
    scf.if %2 {
      %cst_17 = arith.constant 0.000000e+00 : f32
      %24 = vector.broadcast %cst_17 : f32 to vector<1x128x1xf32>
      %c0_18 = arith.constant 0 : index
      %c0_19 = arith.constant 0 : index
      %c0_20 = arith.constant 0 : index
      %25 = vector.load %arg8[%c0_18, %c0_19, %c0_20] : memref<1x128x1xf32, #tpu.memory_space<vmem>>, vector<1x128x1xf32>
      tpu.vector_store %arg8[%c0_18, %c0_19, %c0_20], %24 {strides = array<i32>} : memref<1x128x1xf32, #tpu.memory_space<vmem>>, vector<1x128x1xf32>,
    } else {
    }
    %c0 = arith.constant 0 : index
    %c0_1 = arith.constant 0 : index
    %c0_2 = arith.constant 0 : index
    %3 = vector.load %arg2[%c0, %c0_1, %c0_2] : memref<1x1280x16xf32, #tpu.memory_space<vmem>>, vector<1x1280x16xf32>
    %4 = vector.shape_cast %3 : vector<1x1280x16xf32> to vector<1280x16xf32>
    %5 = arith.truncf %4 : vector<1280x16xf32> to vector<1280x16xbf16>
    %c0_3 = arith.constant 0 : index
    %c0_4 = arith.constant 0 : index
    %6 = vector.load %arg3[%c0_3, %c0_4] : memref<128x1280xbf16, #tpu.memory_space<vmem>>, vector<128x1280xbf16>
    %cst = arith.constant dense<0.000000e+00> : vector<128x16xf32>
    %7 = tpu.matmul %6, %5, %cst {dimension_numbers = #tpu.dot_dimension_numbers<[1], [0], [0], [1], [0, 0, 1, 1], [], []>} : vector<128x1280xbf16>, vector<1280x16xbf16>, vector<128x16xf32> -> vector<128x16xf32>
    %c0_5 = arith.constant 0 : index
    %c0_6 = arith.constant 0 : index
    %8 = vector.load %arg4[%c0_5, %c0_6] : memref<128x1xf32, #tpu.memory_space<vmem>>, vector<128x1xf32>
    %9 = vector.broadcast %8 : vector<128x1xf32> to vector<128x16xf32>
    %10 = arith.addf %7, %9 : vector<128x16xf32>
    %cst_7 = arith.constant 0.000000e+00 : f32
    %11 = vector.broadcast %cst_7 : f32 to vector<128x16xf32>
    %12 = arith.maximumf %10, %11 : vector<128x16xf32>
    %c0_8 = arith.constant 0 : index
    %c0_9 = arith.constant 0 : index
    %c0_10 = arith.constant 0 : index
    %13 = vector.load %arg8[%c0_8, %c0_9, %c0_10] : memref<1x128x1xf32, #tpu.memory_space<vmem>>, vector<1x128x1xf32>
    %14 = vector.shape_cast %13 : vector<1x128x1xf32> to vector<128x1xf32>
    %cst_11 = arith.constant dense<0.000000e+00> : vector<128xf32>
    %15 = vector.multi_reduction <add>, %12, %cst_11 [1] : vector<128x16xf32> to vector<128xf32>
    %16 = vector.shape_cast %15 : vector<128xf32> to vector<128x1xf32>
    %17 = arith.addf %14, %16 : vector<128x1xf32>
    %c0_12 = arith.constant 0 : index
    %c0_13 = arith.constant 0 : index
    %c0_14 = arith.constant 0 : index
    %18 = vector.load %arg8[%c0_12, %c0_13, %c0_14] : memref<1x128x1xf32, #tpu.memory_space<vmem>>, vector<1x128x1xf32>
    %19 = vector.shape_cast %18 : vector<1x128x1xf32> to vector<128x1xf32>
    %20 = vector.shape_cast %17 : vector<128x1xf32> to vector<1x128x1xf32>
    tpu.vector_store %arg8[%c0_12, %c0_13, %c0_14], %20 {strides = array<i32>} : memref<1x128x1xf32, #tpu.memory_space<vmem>>, vector<1x128x1xf32>,
    %c0_i32_15 = arith.constant 0 : i32
    %21 = arith.cmpi eq, %arg1, %c0_i32_15 : i32
    %22 = arith.extui %21 : i1 to i32
    %c0_i32_16 = arith.constant 0 : i32
    %23 = arith.cmpi ne, %22, %c0_i32_16 : i32
    scf.if %23 {
      %c0_17 = arith.constant 0 : index
      %c0_18 = arith.constant 0 : index
      %24 = vector.load %arg5[%c0_17, %c0_18] : memref<128x128xf32, #tpu.memory_space<vmem>>, vector<128x128xf32>
      %c0_19 = arith.constant 0 : index
      %c0_20 = arith.constant 0 : index
      %c0_21 = arith.constant 0 : index
      %25 = vector.load %arg8[%c0_19, %c0_20, %c0_21] : memref<1x128x1xf32, #tpu.memory_space<vmem>>, vector<1x128x1xf32>
      %26 = vector.shape_cast %25 : vector<1x128x1xf32> to vector<128x1xf32>
      %cst_22 = arith.constant dense<0.000000e+00> : vector<128x1xf32>
      %27 = tpu.matmul %24, %26, %cst_22 {dimension_numbers = #tpu.dot_dimension_numbers<[1], [0], [0], [1], [0, 0, 1, 1], [], []>} : vector<128x128xf32>, vector<128x1xf32>, vector<128x1xf32> -> vector<128x1xf32>
      %c0_23 = arith.constant 0 : index
      %c0_24 = arith.constant 0 : index
      %28 = vector.load %arg6[%c0_23, %c0_24] : memref<128x1xf32, #tpu.memory_space<vmem>>, vector<128x1xf32>
      %29 = arith.addf %27, %28 : vector<128x1xf32>
      %c0_25 = arith.constant 0 : index
      %c0_26 = arith.constant 0 : index
      %c0_27 = arith.constant 0 : index
      %30 = vector.load %arg7[%c0_25, %c0_26, %c0_27] : memref<1x128x1xf32, #tpu.memory_space<vmem>>, vector<1x128x1xf32>
      %31 = vector.shape_cast %30 : vector<1x128x1xf32> to vector<128x1xf32>
      %32 = vector.shape_cast %29 : vector<128x1xf32> to vector<1x128x1xf32>
      tpu.vector_store %arg7[%c0_25, %c0_26, %c0_27], %32 {strides = array<i32>} : memref<1x128x1xf32, #tpu.memory_space<vmem>>, vector<1x128x1xf32>,
    } else {
    }
    return
  }
  func.func @transform_0(%arg0: i32, %arg1: i32) -> (i32, i32, i32) {
    %c0_i32 = arith.constant 0 : i32
    %c0_i32_0 = arith.constant 0 : i32
    return %arg0, %c0_i32, %arg1 : i32, i32, i32
  }
  func.func @transform_1(%arg0: i32, %arg1: i32) -> (i32, i32) {
    %c0_i32 = arith.constant 0 : i32
    %c0_i32_0 = arith.constant 0 : i32
    %c0_i32_1 = arith.constant 0 : i32
    return %c0_i32, %c0_i32_0 : i32, i32
  }
  func.func @transform_2(%arg0: i32, %arg1: i32) -> (i32, i32) {
    %c0_i32 = arith.constant 0 : i32
    %c0_i32_0 = arith.constant 0 : i32
    %c0_i32_1 = arith.constant 0 : i32
    return %c0_i32, %c0_i32_0 : i32, i32
  }
  func.func @transform_3(%arg0: i32, %arg1: i32) -> (i32, i32) {
    %c0_i32 = arith.constant 0 : i32
    %c0_i32_0 = arith.constant 0 : i32
    %c0_i32_1 = arith.constant 0 : i32
    return %c0_i32, %c0_i32_0 : i32, i32
  }
  func.func @transform_4(%arg0: i32, %arg1: i32) -> (i32, i32) {
    %c0_i32 = arith.constant 0 : i32
    %c0_i32_0 = arith.constant 0 : i32
    %c0_i32_1 = arith.constant 0 : i32
    return %c0_i32, %c0_i32_0 : i32, i32
  }
  func.func @transform_5(%arg0: i32, %arg1: i32) -> (i32, i32, i32) {
    %c0_i32 = arith.constant 0 : i32
    %c0_i32_0 = arith.constant 0 : i32
    %c0_i32_1 = arith.constant 0 : i32
    return %arg0, %c0_i32, %c0_i32_0 : i32, i32, i32
  }
}

</mosaic_0001>

<bundles_post_ra>
// kernel: monkey_head_forward.1
= control target key start
LH: loop header
LB: loop body
LE: loop exit
PB: predicated region body
PF: predicated region fallthrough
CT: control target
= control target key end

     0   :  { %s2670_s18 = smov 0   ;;  %s2672_s19 = smov 0   ;;  %s3533_s0 = inlined_call_operand.vmem [shape: f32[2,1280,16], index: 0, kind: input, shape index: {}]   ;;  %s3534_s1 = inlined_call_operand.vmem [shape: bf16[128,1280], index: 1, kind: input, shape index: {}]   ;;  %s3535_s2 = inlined_call_operand.vmem [shape: f32[128,1], index: 2, kind: input, shape index: {}]   ;;  %s3536_s3 = inlined_call_operand.vmem [shape: f32[128,128], index: 3, kind: input, shape index: {}]   ;;  %s3537_s4 = inlined_call_operand.vmem [shape: f32[128,1], index: 4, kind: input, shape index: {}]   ;;  %s3538_s5 = inlined_call_operand.vmem [shape: f32[2,128,1], index: 5, kind: output, shape index: {}]  }
   0x1   :  { %s2674_s20 = smov 0  }
   0x2 LB: > { %s27_s21 = sadd.s32 1, %s2632_s19  ;;  %p1970_p0 = scmp.ge.s32.totalorder %s2636_s20, 1  ;;  %s2636_s20 = sphi %s2674_s20, %s15_s20   ;;  %s2632_s19 = sphi %s2672_s19, %s3566_s19   ;;  %s2628_s18 = sphi %s2670_s18, %s3565_s18  }
   0x3   : > { %p29_p1 = scmp.ge.s32.totalorder %s27_s21, 2  ;;  %p204_p2 = scmp.lt.s32.totalorder %s2636_s20, 3 }
   0x5   : > { %s3568_s21 = smov (%p29_p1, %s27_s21), 0  ;;  %p205_p3 = pnand %p1970_p0, %p204_p2 }
   0x7   : > { %208 = sbr.rel (%p205_p3) target bundleno = 851 (0x353), region = 40 }
   0xc   : > { %p235_p4 = scmp.lt.s32.totalorder %s2628_s18, 1  ;;  %v2496_v0 = vld [vmem:[%s3534_s1 + $0x4] ss:$40 sps:$4 sm:$0xff]   ;;  %v2638_v1 = vmov 0   ;;  %vm253_vm0 = vcmask 7168   ;;  %vm1603_vm1 = vcmask 130048  }
   0xd   : > { %2493 = vset.pattern.permute.xlu1 %v2638_v1  ;;  %2492 = vset.pattern.permute.xlu0 %v2638_v1  ;;  %v2499_v2 = vld [vmem:[%s3534_s1 + $0xc] ss:$40 sps:$4 sm:$0xff]  }
   0xe   : > { %s3570_s18 = smov (!%p235_p4, %s2628_s18), 1  ;;  %1118 = vmatprep.mubr.bf16.mxu0 %v2496_v0  ;;  %1215 = vmatprep.mubr.bf16.mxu1 %v2499_v2 }
   0xf   : > { %s2465_s26 = smul.u32 1280, %s3570_s18  ;;  %s2056_s24 = sshll.u32 %s3570_s18, 7 }
  0x10   : > { %s3445_s30 = scalar_lea.vmem %s3538_s5, %s2056_s24 }
  0x11   : > { %s2700_s29 = scalar_lea.vmem %s3533_s0, %s2465_s26 }
  0x12   : > { %v300_v3 = vld [vmem:[%s2700_s29 + $0xf0] sm:$0xff]  ;;  %v301_v4 = vld [vmem:[%s2700_s29 + $0xf8] sm:$0xff]  ;;  %v298_v14 = vld [vmem:[%s2700_s29 + $0xe0] sm:$0xff] }
  0x13   : > { %v284_v5 = vld [vmem:[%s2700_s29 + $0x70] sm:$0xff]  ;;  %v445_v6 = vpack.c.bf16 %v301_v4, %v300_v3  ;;  %v285_v7 = vld [vmem:[%s2700_s29 + $0x78] sm:$0xff]  ;;  %v299_v16 = vld [vmem:[%s2700_s29 + $0xe8] sm:$0xff] }
  0x14   : > { %v332_v8 = vld [vmem:[%s2700_s29 + $0x1f0] sm:$0xff]  ;;  %v333_v9 = vld [vmem:[%s2700_s29 + $0x1f8] sm:$0xff]  ;;  %v437_v10 = vpack.c.bf16 %v285_v7, %v284_v5  ;;  %v282_v17 = vld [vmem:[%s2700_s29 + $0x60] sm:$0xff]  ;;  %v444_v19 = vpack.c.bf16 %v299_v16, %v298_v14 }
  0x15   : > { %v461_v11 = vpack.c.bf16 %v333_v9, %v332_v8  ;;  %v316_v12 = vld [vmem:[%s2700_s29 + $0x170] sm:$0xff]  ;;  %v317_v13 = vld [vmem:[%s2700_s29 + $0x178] sm:$0xff]  ;;  %2057 = vmatprep.subr.bf16.mxu0 %v445_v6  ;;  %v283_v18 = vld [vmem:[%s2700_s29 + $0x68] sm:$0xff] }
  0x16   : > { %v453_v15 = vpack.c.bf16 %v317_v13, %v316_v12  ;;  %2058 = vmatpush3.bf16.msra.mxu0 %v437_v10  ;;  %v436_v20 = vpack.c.bf16 %v283_v18, %v282_v17  ;;  %v330_v21 = vld [vmem:[%s2700_s29 + $0x1e0] sm:$0xff]  ;;  %v331_v22 = vld [vmem:[%s2700_s29 + $0x1e8] sm:$0xff]  ;;  %v296_v26 = vld [vmem:[%s2700_s29 + $0xd0] sm:$0xff] }
  0x17   : > { %2121 = vmatprep.subr.bf16.mxu1 %v461_v11  ;;  %v314_v23 = vld [vmem:[%s2700_s29 + $0x160] sm:$0xff]  ;;  %v460_v24 = vpack.c.bf16 %v331_v22, %v330_v21  ;;  %v315_v25 = vld [vmem:[%s2700_s29 + $0x168] sm:$0xff]  ;;  %v297_v27 = vld [vmem:[%s2700_s29 + $0xd8] sm:$0xff]  ;;  %2059 = vmatprep.subr.bf16.mxu0 %v444_v19 }
  0x18   : > { %2122 = vmatpush3.bf16.msra.mxu1 %v453_v15  ;;  %v452_v28 = vpack.c.bf16 %v315_v25, %v314_v23  ;;  %v443_v29 = vpack.c.bf16 %v297_v27, %v296_v26  ;;  %v280_v30 = vld [vmem:[%s2700_s29 + $0x50] sm:$0xff]  ;;  %v281_v31 = vld [vmem:[%s2700_s29 + $0x58] sm:$0xff]  ;;  %v294_v38 = vld [vmem:[%s2700_s29 + $0xc0] sm:$0xff] }
  0x19   : > { %v328_v32 = vld [vmem:[%s2700_s29 + $0x1d0] sm:$0xff]  ;;  %2123 = vmatprep.subr.bf16.mxu1 %v460_v24  ;;  %v329_v33 = vld [vmem:[%s2700_s29 + $0x1d8] sm:$0xff]  ;;  %v435_v36 = vpack.c.bf16 %v281_v31, %v280_v30  ;;  %v295_v39 = vld [vmem:[%s2700_s29 + $0xc8] sm:$0xff] }
  0x1a   : > { %v312_v34 = vld [vmem:[%s2700_s29 + $0x150] sm:$0xff]  ;;  %v313_v35 = vld [vmem:[%s2700_s29 + $0x158] sm:$0xff]  ;;  %2060 = vmatpush3.bf16.msra.mxu0 %v436_v20  ;;  %v459_v37 = vpack.c.bf16 %v329_v33, %v328_v32  ;;  %v278_v40 = vld [vmem:[%s2700_s29 + $0x40] sm:$0xff]  ;;  %v442_v42 = vpack.c.bf16 %v295_v39, %v294_v38 }
  0x1b   : > { %2061 = vmatprep.subr.bf16.mxu0 %v443_v29  ;;  %v451_v41 = vpack.c.bf16 %v313_v35, %v312_v34  ;;  %v279_v43 = vld [vmem:[%s2700_s29 + $0x48] sm:$0xff]  ;;  %v326_v44 = vld [vmem:[%s2700_s29 + $0x1c0] sm:$0xff]  ;;  %v292_v49 = vld [vmem:[%s2700_s29 + $0xb0] sm:$0xff] }
  0x1c   : > { %2124 = vmatpush3.bf16.msra.mxu1 %v452_v28  ;;  %v327_v45 = vld [vmem:[%s2700_s29 + $0x1c8] sm:$0xff]  ;;  %v310_v47 = vld [vmem:[%s2700_s29 + $0x140] sm:$0xff]  ;;  %v293_v50 = vld [vmem:[%s2700_s29 + $0xb8] sm:$0xff]  ;;  %v434_v51 = vpack.c.bf16 %v279_v43, %v278_v40 }
  0x1d   : > { %2125 = vmatprep.subr.bf16.mxu1 %v459_v37  ;;  %v458_v46 = vpack.c.bf16 %v327_v45, %v326_v44  ;;  %v311_v48 = vld [vmem:[%s2700_s29 + $0x148] sm:$0xff]  ;;  %v324_v52 = vld [vmem:[%s2700_s29 + $0x1b0] sm:$0xff]  ;;  %v325_v53 = vld [vmem:[%s2700_s29 + $0x1b8] sm:$0xff]  ;;  %v441_v55 = vpack.c.bf16 %v293_v50, %v292_v49 }
  0x1e   : > { %2062 = vmatpush3.bf16.msra.mxu0 %v435_v36  ;;  %v450_v54 = vpack.c.bf16 %v311_v48, %v310_v47  ;;  %v276_v56 = vld [vmem:[%s2700_s29 + $0x30] sm:$0xff]  ;;  %v277_v57 = vld [vmem:[%s2700_s29 + $0x38] sm:$0xff]  ;;  %v457_v59 = vpack.c.bf16 %v325_v53, %v324_v52  ;;  %v290_v61 = vld [vmem:[%s2700_s29 + $0xa0] sm:$0xff] }
  0x1f   : > { %2063 = vmatprep.subr.bf16.mxu0 %v442_v42  ;;  %v308_v58 = vld [vmem:[%s2700_s29 + $0x130] sm:$0xff]  ;;  %v309_v60 = vld [vmem:[%s2700_s29 + $0x138] sm:$0xff]  ;;  %v291_v62 = vld [vmem:[%s2700_s29 + $0xa8] sm:$0xff]  ;;  %v433_v1 = vpack.c.bf16 %v277_v57, %v276_v56 }
  0x20   : > { %2126 = vmatpush3.bf16.msra.mxu1 %v451_v41  ;;  %v322_v63 = vld [vmem:[%s2700_s29 + $0x1a0] sm:$0xff]  ;;  %v323_v0 = vld [vmem:[%s2700_s29 + $0x1a8] sm:$0xff]  ;;  %v449_v2 = vpack.c.bf16 %v309_v60, %v308_v58  ;;  %v440_v3 = vpack.c.bf16 %v291_v62, %v290_v61  ;;  %v288_v9 = vld [vmem:[%s2700_s29 + $0x90] sm:$0xff] }
  0x21   : > { %2127 = vmatprep.subr.bf16.mxu1 %v458_v46  ;;  %v274_v4 = vld [vmem:[%s2700_s29 + $0x20] sm:$0xff]  ;;  %v275_v5 = vld [vmem:[%s2700_s29 + $0x28] sm:$0xff]  ;;  %v456_v7 = vpack.c.bf16 %v323_v0, %v322_v63  ;;  %v289_v10 = vld [vmem:[%s2700_s29 + $0x98] sm:$0xff] }
  0x22   : > { %2064 = vmatpush3.bf16.msra.mxu0 %v434_v51  ;;  %v306_v6 = vld [vmem:[%s2700_s29 + $0x120] sm:$0xff]  ;;  %v307_v8 = vld [vmem:[%s2700_s29 + $0x128] sm:$0xff]  ;;  %v320_v11 = vld [vmem:[%s2700_s29 + $0x190] sm:$0xff]  ;;  %v432_v13 = vpack.c.bf16 %v275_v5, %v274_v4  ;;  %v439_v18 = vpack.c.bf16 %v289_v10, %v288_v9 }
  0x23   : > { %2065 = vmatprep.subr.bf16.mxu0 %v441_v55  ;;  %v321_v12 = vld [vmem:[%s2700_s29 + $0x198] sm:$0xff]  ;;  %v272_v14 = vld [vmem:[%s2700_s29 + $0x10] sm:$0xff]  ;;  %v448_v17 = vpack.c.bf16 %v307_v8, %v306_v6  ;;  %v286_v20 = vld [vmem:[%s2700_s29 + $0x80] sm:$0xff] }
  0x24   : > { %2128 = vmatpush3.bf16.msra.mxu1 %v450_v54  ;;  %v273_v15 = vld [vmem:[%s2700_s29 + $0x18] sm:$0xff]  ;;  %v304_v16 = vld [vmem:[%s2700_s29 + $0x110] sm:$0xff]  ;;  %v455_v21 = vpack.c.bf16 %v321_v12, %v320_v11  ;;  %v287_v22 = vld [vmem:[%s2700_s29 + $0x88] sm:$0xff] }
  0x25   : > { %2129 = vmatprep.subr.bf16.mxu1 %v457_v59  ;;  %v305_v19 = vld [vmem:[%s2700_s29 + $0x118] sm:$0xff]  ;;  %v318_v23 = vld [vmem:[%s2700_s29 + $0x180] sm:$0xff]  ;;  %v319_v24 = vld [vmem:[%s2700_s29 + $0x188] sm:$0xff]  ;;  %v431_v25 = vpack.c.bf16 %v273_v15, %v272_v14  ;;  %v438_v29 = vpack.c.bf16 %v287_v22, %v286_v20 }
  0x26   : > { %2066 = vmatpush3.bf16.msra.mxu0 %v433_v1  ;;  %v270_v26 = vld [vmem:[%s2700_s29] sm:$0xff]  ;;  %v271_v27 = vld [vmem:[%s2700_s29 + $0x8] sm:$0xff]  ;;  %v447_v28 = vpack.c.bf16 %v305_v19, %v304_v16  ;;  %v454_v32 = vpack.c.bf16 %v319_v24, %v318_v23  ;;  %v364_v33 = vld [vmem:[%s2700_s29 + $0x2f0] sm:$0xff] }
  0x27   : > { %2067 = vmatprep.subr.bf16.mxu0 %v440_v3  ;;  %v302_v30 = vld [vmem:[%s2700_s29 + $0x100] sm:$0xff]  ;;  %v303_v31 = vld [vmem:[%s2700_s29 + $0x108] sm:$0xff]  ;;  %v365_v34 = vld [vmem:[%s2700_s29 + $0x2f8] sm:$0xff]  ;;  %v430_v35 = vpack.c.bf16 %v271_v27, %v270_v26 }
  0x28   : > { %2130 = vmatpush3.bf16.msra.mxu1 %v449_v2  ;;  %v2494_v36 = vld [vmem:[%s3534_s1] ss:$40 sps:$4 sm:$0xff]   ;;  %v446_v37 = vpack.c.bf16 %v303_v31, %v302_v30  ;;  %v477_v38 = vpack.c.bf16 %v365_v34, %v364_v33  ;;  %v348_v39 = vld [vmem:[%s2700_s29 + $0x270] sm:$0xff]  ;;  %v397_v41 = vld [vmem:[%s2700_s29 + $0x3f8] sm:$0xff] }
  0x29   : > { %2131 = vmatprep.subr.bf16.mxu1 %v456_v7  ;;  %v396_v40 = vld [vmem:[%s2700_s29 + $0x3f0] sm:$0xff]  ;;  %v349_v44 = vld [vmem:[%s2700_s29 + $0x278] sm:$0xff]  ;;  %v362_v48 = vld [vmem:[%s2700_s29 + $0x2e0] sm:$0xff] }
  0x2a   : > { %2068 = vmatpush3.bf16.msra.mxu0 %v432_v13  ;;  %v2497_v42 = vld [vmem:[%s3534_s1 + $0x8] ss:$40 sps:$4 sm:$0xff]   ;;  %v2500_v43 = vld [vmem:[%s3534_s1 + $0x54] ss:$40 sps:$4 sm:$0xff]   ;;  %v493_v45 = vpack.c.bf16 %v397_v41, %v396_v40  ;;  %v394_v50 = vld [vmem:[%s2700_s29 + $0x3e0] sm:$0xff]  ;;  %v469_v53 = vpack.c.bf16 %v349_v44, %v348_v39 }
  0x2b   : > { %2069 = vmatprep.subr.bf16.mxu0 %v439_v18  ;;  %v380_v46 = vld [vmem:[%s2700_s29 + $0x370] sm:$0xff]  ;;  %v381_v47 = vld [vmem:[%s2700_s29 + $0x378] sm:$0xff]  ;;  %v363_v49 = vld [vmem:[%s2700_s29 + $0x2e8] sm:$0xff] }
  0x2c   : > { %2132 = vmatpush3.bf16.msra.mxu1 %v448_v17  ;;  %v395_v51 = vld [vmem:[%s2700_s29 + $0x3e8] sm:$0xff]  ;;  %v2503_v52 = vld [vmem:[%s3534_s1 + $0x5c] ss:$40 sps:$4 sm:$0xff]   ;;  %v485_v56 = vpack.c.bf16 %v381_v47, %v380_v46  ;;  %v476_v57 = vpack.c.bf16 %v363_v49, %v362_v48  ;;  %v360_v60 = vld [vmem:[%s2700_s29 + $0x2d0] sm:$0xff] }
  0x2d   : > { %2133 = vmatprep.subr.bf16.mxu1 %v455_v21  ;;  %v346_v54 = vld [vmem:[%s2700_s29 + $0x260] sm:$0xff]  ;;  %v347_v55 = vld [vmem:[%s2700_s29 + $0x268] sm:$0xff]  ;;  %v492_v61 = vpack.c.bf16 %v395_v51, %v394_v50  ;;  %v361_v62 = vld [vmem:[%s2700_s29 + $0x2d8] sm:$0xff] }
  0x2e   : > { %2070 = vmatpush3.bf16.msra.mxu0 %v431_v25  ;;  %v378_v58 = vld [vmem:[%s2700_s29 + $0x360] sm:$0xff]  ;;  %v379_v59 = vld [vmem:[%s2700_s29 + $0x368] sm:$0xff]  ;;  %v2502_v63 = vld [vmem:[%s3534_s1 + $0x50] ss:$40 sps:$4 sm:$0xff]   ;;  %v468_v0 = vpack.c.bf16 %v347_v55, %v346_v54  ;;  %v475_v7 = vpack.c.bf16 %v361_v62, %v360_v60 }
  0x2f   : > { %2071 = vmatprep.subr.bf16.mxu0 %v438_v29  ;;  %v344_v1 = vld [vmem:[%s2700_s29 + $0x250] sm:$0xff]  ;;  %v393_v3 = vld [vmem:[%s2700_s29 + $0x3d8] sm:$0xff]  ;;  %v2506_v5 = vld [vmem:[%s3534_s1 + $0xa4] ss:$40 sps:$4 sm:$0xff]   ;;  %v484_v6 = vpack.c.bf16 %v379_v59, %v378_v58 }
  0x30   : > { %2134 = vmatpush3.bf16.msra.mxu1 %v447_v28  ;;  %v392_v2 = vld [vmem:[%s2700_s29 + $0x3d0] sm:$0xff]  ;;  %v2505_v4 = vld [vmem:[%s3534_s1 + $0x58] ss:$40 sps:$4 sm:$0xff]   ;;  %v359_v13 = vld [vmem:[%s2700_s29 + $0x2c8] sm:$0xff] }
  0x31   : > { %2135 = vmatprep.subr.bf16.mxu1 %v454_v32  ;;  %v345_v8 = vld [vmem:[%s2700_s29 + $0x258] sm:$0xff]  ;;  %v376_v9 = vld [vmem:[%s2700_s29 + $0x350] sm:$0xff]  ;;  %v491_v11 = vpack.c.bf16 %v393_v3, %v392_v2  ;;  %v358_v12 = vld [vmem:[%s2700_s29 + $0x2c0] sm:$0xff] }
  0x32   : > { %2072 = vmatpush3.bf16.msra.mxu0 %v430_v35  ;;  %v377_v10 = vld [vmem:[%s2700_s29 + $0x358] sm:$0xff]  ;;  %v603_v14 = vld [vmem:[%s3535_s2 + $0x68] sm:$0xff]  ;;  %v390_v15 = vld [vmem:[%s2700_s29 + $0x3c0] sm:$0xff]  ;;  %v467_v18 = vpack.c.bf16 %v345_v8, %v344_v1  ;;  %v474_v20 = vpack.c.bf16 %v359_v13, %v358_v12 }
  0x33   : > { %2185 = vmatprep.subr.bf16.mxu0 %v477_v38  ;;  %673 = vperm.xlu1 %2493, %v603_v14   ;;  %v391_v16 = vld [vmem:[%s2700_s29 + $0x3c8] sm:$0xff]  ;;  %v483_v19 = vpack.c.bf16 %v377_v10, %v376_v9  ;;  %v342_v21 = vld [vmem:[%s2700_s29 + $0x240] sm:$0xff]  ;;  %v356_v26 = vld [vmem:[%s2700_s29 + $0x2b0] sm:$0xff] }
  0x34   : > { %2136 = vmatpush3.bf16.msra.mxu1 %v446_v37  ;;  %v2509_v17 = vld [vmem:[%s3534_s1 + $0xac] ss:$40 sps:$4 sm:$0xff]   ;;  %v374_v23 = vld [vmem:[%s2700_s29 + $0x340] sm:$0xff]  ;;  %v490_v24 = vpack.c.bf16 %v391_v16, %v390_v15  ;;  %v357_v27 = vld [vmem:[%s2700_s29 + $0x2b8] sm:$0xff] }
  0x35   : > { %2249 = vmatprep.subr.bf16.mxu1 %v493_v45  ;;  %1119 = vmatmul.mubr.bf16.vlgmr.msra.gmra.mxu0 %v2494_v36  ;;  %v343_v22 = vld [vmem:[%s2700_s29 + $0x248] sm:$0xff]  ;;  %v605_v28 = vld [vmem:[%s3535_s2 + $0x78] sm:$0xff]  ;;  %v602_v31 = vld [vmem:[%s3535_s2 + $0x60] sm:$0xff]  ;;  %v473_v35 = vpack.c.bf16 %v357_v27, %v356_v26 }
  0x36   : > { %1126 = vmatprep.mubr.bf16.mxu0 %v2500_v43  ;;  %2186 = vmatpush3.bf16.msra.mxu0 %v469_v53  ;;  %v375_v25 = vld [vmem:[%s2700_s29 + $0x348] sm:$0xff]  ;;  %v466_v30 = vpack.c.bf16 %v343_v22, %v342_v21  ;;  %v340_v32 = vld [vmem:[%s2700_s29 + $0x230] sm:$0xff]  ;;  %v341_v33 = vld [vmem:[%s2700_s29 + $0x238] sm:$0xff] }
  0x37   : > { %1216 = vmatmul.mubr.bf16.vlgmr.msra.gmra.mxu1 %v2497_v42  ;;  %2187 = vmatprep.subr.bf16.mxu0 %v476_v57  ;;  %v2508_v29 = vld [vmem:[%s3534_s1 + $0xa0] ss:$40 sps:$4 sm:$0xff]   ;;  %v482_v34 = vpack.c.bf16 %v375_v25, %v374_v23  ;;  %v388_v36 = vld [vmem:[%s2700_s29 + $0x3b0] sm:$0xff]  ;;  %v389_v37 = vld [vmem:[%s2700_s29 + $0x3b8] sm:$0xff]  ;;  %v465_v46 = vpack.c.bf16 %v341_v33, %v340_v32 }
  0x38   : > { %1223 = vmatprep.mubr.bf16.mxu1 %v2503_v52  ;;  %2250 = vmatpush3.bf16.msra.mxu1 %v485_v56  ;;  %v372_v38 = vld [vmem:[%s2700_s29 + $0x330] sm:$0xff]  ;;  %v489_v39 = vpack.c.bf16 %v389_v37, %v388_v36  ;;  %v373_v40 = vld [vmem:[%s2700_s29 + $0x338] sm:$0xff]  ;;  %v354_v41 = vld [vmem:[%s2700_s29 + $0x2a0] sm:$0xff] }
  0x39   : > { %2251 = vmatprep.subr.bf16.mxu1 %v492_v61  ;;  %683 = vperm.xlu0 %2492, %v605_v28   ;;  %v355_v42 = vld [vmem:[%s2700_s29 + $0x2a8] sm:$0xff]  ;;  %v2512_v44 = vld [vmem:[%s3534_s1 + $0xf4] ss:$40 sps:$4 sm:$0xff]   ;;  %v338_v47 = vld [vmem:[%s2700_s29 + $0x220] sm:$0xff]  ;;  %v481_v50 = vpack.c.bf16 %v373_v40, %v372_v38 }
  0x3a   : > { %2188 = vmatpush3.bf16.msra.mxu0 %v468_v0  ;;  %v2511_v43 = vld [vmem:[%s3534_s1 + $0xa8] ss:$40 sps:$4 sm:$0xff]   ;;  %v2515_v45 = vld [vmem:[%s3534_s1 + $0xfc] ss:$40 sps:$4 sm:$0xff]   ;;  %668 = vperm.xlu1 %2493, %v602_v31   ;;  %v472_v51 = vpack.c.bf16 %v355_v42, %v354_v41  ;;  %v2517_v62 = vld [vmem:[%s3534_s1 + $0xf8] ss:$40 sps:$4 sm:$0xff]  }
  0x3b   : > { %2189 = vmatprep.subr.bf16.mxu0 %v475_v7  ;;  %v386_v48 = vld [vmem:[%s2700_s29 + $0x3a0] sm:$0xff]  ;;  %v387_v49 = vld [vmem:[%s2700_s29 + $0x3a8] sm:$0xff]  ;;  %v604_v53 = vld [vmem:[%s3535_s2 + $0x70] sm:$0xff] }
  0x3c   : > { %2252 = vmatpush3.bf16.msra.mxu1 %v484_v6  ;;  %v339_v52 = vld [vmem:[%s2700_s29 + $0x228] sm:$0xff]  ;;  %v370_v54 = vld [vmem:[%s2700_s29 + $0x320] sm:$0xff]  ;;  %v600_v56 = vld [vmem:[%s3535_s2 + $0x50] sm:$0xff]  ;;  %v488_v57 = vpack.c.bf16 %v387_v49, %v386_v48 }
  0x3d   : > { %1127 = vmatmul.mubr.bf16.gmra.mxu0 %v2502_v63  ;;  %2253 = vmatprep.subr.bf16.mxu1 %v491_v11  ;;  %v371_v55 = vld [vmem:[%s2700_s29 + $0x328] sm:$0xff]  ;;  %v352_v58 = vld [vmem:[%s2700_s29 + $0x290] sm:$0xff]  ;;  %v353_v59 = vld [vmem:[%s2700_s29 + $0x298] sm:$0xff]  ;;  %v464_v61 = vpack.c.bf16 %v339_v52, %v338_v47 }
  0x3e   : > { %1134 = vmatprep.mubr.bf16.mxu0 %v2506_v5  ;;  %2190 = vmatpush3.bf16.msra.mxu0 %v467_v18  ;;  %v2514_v60 = vld [vmem:[%s3534_s1 + $0xf0] ss:$40 sps:$4 sm:$0xff]   ;;  %v2518_v63 = vld [vmem:[%s3534_s1 + $0x144] ss:$40 sps:$4 sm:$0xff]   ;;  %v480_v0 = vpack.c.bf16 %v371_v55, %v370_v54  ;;  %v471_v1 = vpack.c.bf16 %v353_v59, %v352_v58  ;;  %v2520_v27 = vld [vmem:[%s3534_s1 + $0x140] ss:$40 sps:$4 sm:$0xff]  }
  0x3f   : > { %1224 = vmatmul.mubr.bf16.gmra.mxu1 %v2505_v4  ;;  %2191 = vmatprep.subr.bf16.mxu0 %v474_v20  ;;  %v601_v2 = vld [vmem:[%s3535_s2 + $0x58] sm:$0xff]  ;;  %v336_v3 = vld [vmem:[%s2700_s29 + $0x210] sm:$0xff]  ;;  %v350_v9 = vld [vmem:[%s2700_s29 + $0x280] sm:$0xff] }
  0x40   : > { %1231 = vmatprep.mubr.bf16.mxu1 %v2509_v17  ;;  %2254 = vmatpush3.bf16.msra.mxu1 %v483_v19  ;;  %v337_v4 = vld [vmem:[%s2700_s29 + $0x218] sm:$0xff]  ;;  %v384_v5 = vld [vmem:[%s2700_s29 + $0x390] sm:$0xff]  ;;  %v598_v11 = vld [vmem:[%s3535_s2 + $0x40] sm:$0xff] }
  0x41   : > { %2255 = vmatprep.subr.bf16.mxu1 %v490_v24  ;;  %678 = vperm.xlu0 %2492, %v604_v53   ;;  %v385_v6 = vld [vmem:[%s2700_s29 + $0x398] sm:$0xff]  ;;  %v368_v7 = vld [vmem:[%s2700_s29 + $0x310] sm:$0xff]  ;;  %v351_v12 = vld [vmem:[%s2700_s29 + $0x288] sm:$0xff]  ;;  %v463_v13 = vpack.c.bf16 %v337_v4, %v336_v3 }
  0x42   : > { %2192 = vmatpush3.bf16.msra.mxu0 %v466_v30  ;;  %658 = vperm.xlu1 %2493, %v600_v56   ;;  %v369_v8 = vld [vmem:[%s2700_s29 + $0x318] sm:$0xff]  ;;  %v2521_v10 = vld [vmem:[%s3534_s1 + $0x14c] ss:$40 sps:$4 sm:$0xff]   ;;  %v487_v14 = vpack.c.bf16 %v385_v6, %v384_v5  ;;  %v334_v15 = vld [vmem:[%s2700_s29 + $0x200] sm:$0xff]  ;;  %v470_v19 = vpack.c.bf16 %v351_v12, %v350_v9 }
  0x43   : > { %2193 = vmatprep.subr.bf16.mxu0 %v473_v35  ;;  %v335_v16 = vld [vmem:[%s2700_s29 + $0x208] sm:$0xff]  ;;  %v382_v17 = vld [vmem:[%s2700_s29 + $0x380] sm:$0xff]  ;;  %v479_v18 = vpack.c.bf16 %v369_v8, %v368_v7  ;;  %v596_v25 = vld [vmem:[%s3535_s2 + $0x30] sm:$0xff] }
  0x44   : > { %2256 = vmatpush3.bf16.msra.mxu1 %v482_v34  ;;  %v383_v20 = vld [vmem:[%s2700_s29 + $0x388] sm:$0xff]  ;;  %v366_v22 = vld [vmem:[%s2700_s29 + $0x300] sm:$0xff]  ;;  %v462_v26 = vpack.c.bf16 %v335_v16, %v334_v15  ;;  %v2524_v30 = vld [vmem:[%s3534_s1 + $0x194] ss:$40 sps:$4 sm:$0xff]  }
  0x45   : > { %1135 = vmatmul.mubr.bf16.gmra.mxu0 %v2508_v29  ;;  %2257 = vmatprep.subr.bf16.mxu1 %v489_v39  ;;  %v486_v21 = vpack.c.bf16 %v383_v20, %v382_v17  ;;  %v599_v23 = vld [vmem:[%s3535_s2 + $0x48] sm:$0xff]  ;;  %v2527_v31 = vld [vmem:[%s3534_s1 + $0x19c] ss:$40 sps:$4 sm:$0xff]   ;;  %v2526_v34 = vld [vmem:[%s3534_s1 + $0x190] ss:$40 sps:$4 sm:$0xff]  }
  0x46   : > { %1142 = vmatprep.mubr.bf16.mxu0 %v2512_v44  ;;  %2194 = vmatpush3.bf16.msra.mxu0 %v465_v46  ;;  %v367_v24 = vld [vmem:[%s2700_s29 + $0x308] sm:$0xff]  ;;  %v597_v32 = vld [vmem:[%s3535_s2 + $0x38] sm:$0xff]  ;;  %v594_v33 = vld [vmem:[%s3535_s2 + $0x20] sm:$0xff] }
  0x47   : > { %1232 = vmatmul.mubr.bf16.gmra.mxu1 %v2511_v43  ;;  %2195 = vmatprep.subr.bf16.mxu0 %v472_v51  ;;  %v2523_v28 = vld [vmem:[%s3534_s1 + $0x148] ss:$40 sps:$4 sm:$0xff]   ;;  %v478_v29 = vpack.c.bf16 %v367_v24, %v366_v22  ;;  %v2529_v36 = vld [vmem:[%s3534_s1 + $0x198] ss:$40 sps:$4 sm:$0xff]   ;;  %v2530_v38 = vld [vmem:[%s3534_s1 + $0x1e4] ss:$40 sps:$4 sm:$0xff]  }
  0x48   : > { %1239 = vmatprep.mubr.bf16.mxu1 %v2515_v45  ;;  %2258 = vmatpush3.bf16.msra.mxu1 %v481_v50  ;;  %v595_v35 = vld [vmem:[%s3535_s2 + $0x28] sm:$0xff]  ;;  %v592_v37 = vld [vmem:[%s3535_s2 + $0x10] sm:$0xff]  ;;  %v429_v41 = vld [vmem:[%s2700_s29 + $0x4f8] sm:$0xff] }
  0x49   : > { %2259 = vmatprep.subr.bf16.mxu1 %v488_v57  ;;  %663 = vperm.xlu0 %2492, %v601_v2   ;;  %v2533_v39 = vld [vmem:[%s3534_s1 + $0x1ec] ss:$40 sps:$4 sm:$0xff]   ;;  %v593_v42 = vld [vmem:[%s3535_s2 + $0x18] sm:$0xff]  ;;  %v590_v44 = vld [vmem:[%s3535_s2] sm:$0xff] }
  0x4a   : > { %2196 = vmatpush3.bf16.msra.mxu0 %v464_v61  ;;  %648 = vperm.xlu1 %2493, %v598_v11   ;;  %v428_v40 = vld [vmem:[%s2700_s29 + $0x4f0] sm:$0xff]  ;;  %v591_v45 = vld [vmem:[%s3535_s2 + $0x8] sm:$0xff]  ;;  %v2539_v49 = vld [vmem:[%s3534_s1 + $0x23c] ss:$40 sps:$4 sm:$0xff]  }
  0x4b   : > { %2197 = vmatprep.subr.bf16.mxu0 %v471_v1  ;;  %v509_v43 = vpack.c.bf16 %v429_v41, %v428_v40  ;;  %v2532_v46 = vld [vmem:[%s3534_s1 + $0x1e0] ss:$40 sps:$4 sm:$0xff]   ;;  %v2536_v48 = vld [vmem:[%s3534_s1 + $0x234] ss:$40 sps:$4 sm:$0xff]   ;;  %v2538_v50 = vld [vmem:[%s3534_s1 + $0x230] ss:$40 sps:$4 sm:$0xff]  }
  0x4c   : > { %2260 = vmatpush3.bf16.msra.mxu1 %v480_v0  ;;  %v2535_v47 = vld [vmem:[%s3534_s1 + $0x1e8] ss:$40 sps:$4 sm:$0xff]   ;;  %v2541_v51 = vld [vmem:[%s3534_s1 + $0x238] ss:$40 sps:$4 sm:$0xff]   ;;  %v2544_v52 = vld [vmem:[%s3534_s1 + $0x14] ss:$40 sps:$4 sm:$0xff]  }
  0x4d   : > { %1143 = vmatmul.mubr.bf16.gmra.mxu0 %v2514_v60  ;;  %2261 = vmatprep.subr.bf16.mxu1 %v487_v14  ;;  %v2547_v53 = vld [vmem:[%s3534_s1 + $0x1c] ss:$40 sps:$4 sm:$0xff]   ;;  %v2542_v54 = vld [vmem:[%s3534_s1 + $0x10] ss:$40 sps:$4 sm:$0xff]   ;;  %v427_v59 = vld [vmem:[%s2700_s29 + $0x4e8] sm:$0xff] }
  0x4e   : > { %1150 = vmatprep.mubr.bf16.mxu0 %v2518_v63  ;;  %2198 = vmatpush3.bf16.msra.mxu0 %v463_v13  ;;  %v412_v55 = vld [vmem:[%s2700_s29 + $0x470] sm:$0xff]  ;;  %v2545_v56 = vld [vmem:[%s3534_s1 + $0x18] ss:$40 sps:$4 sm:$0xff]   ;;  %v2548_v60 = vld [vmem:[%s3534_s1 + $0x64] ss:$40 sps:$4 sm:$0xff]  }
  0x4f   : > { %1240 = vmatmul.mubr.bf16.gmra.mxu1 %v2517_v62  ;;  %2199 = vmatprep.subr.bf16.mxu0 %v470_v19  ;;  %v413_v57 = vld [vmem:[%s2700_s29 + $0x478] sm:$0xff]  ;;  %v426_v58 = vld [vmem:[%s2700_s29 + $0x4e0] sm:$0xff]  ;;  %v2551_v61 = vld [vmem:[%s3534_s1 + $0x6c] ss:$40 sps:$4 sm:$0xff]  }
  0x50   : > { %1247 = vmatprep.mubr.bf16.mxu1 %v2521_v10  ;;  %2262 = vmatpush3.bf16.msra.mxu1 %v479_v18  ;;  %v501_v62 = vpack.c.bf16 %v413_v57, %v412_v55  ;;  %v410_v63 = vld [vmem:[%s2700_s29 + $0x460] sm:$0xff]  ;;  %v508_v0 = vpack.c.bf16 %v427_v59, %v426_v58  ;;  %v411_v1 = vld [vmem:[%s2700_s29 + $0x468] sm:$0xff]  ;;  %v424_v2 = vld [vmem:[%s2700_s29 + $0x4d0] sm:$0xff] }
  0x51   : > { %653 = vperm.xlu0 %2492, %v599_v23   ;;  %2263 = vmatprep.subr.bf16.mxu1 %v486_v21  ;;  %v425_v3 = vld [vmem:[%s2700_s29 + $0x4d8] sm:$0xff]  ;;  %v2550_v4 = vld [vmem:[%s3534_s1 + $0x60] ss:$40 sps:$4 sm:$0xff]   ;;  %v500_v5 = vpack.c.bf16 %v411_v1, %v410_v63  ;;  %v408_v6 = vld [vmem:[%s2700_s29 + $0x450] sm:$0xff] }
  0x52   : > { %638 = vperm.xlu1 %2493, %v596_v25   ;;  %2200 = vmatpush3.bf16.msra.mxu0 %v462_v26  ;;  %v507_v7 = vpack.c.bf16 %v425_v3, %v424_v2  ;;  %v409_v8 = vld [vmem:[%s2700_s29 + $0x458] sm:$0xff]  ;;  %v422_v9 = vld [vmem:[%s2700_s29 + $0x4c0] sm:$0xff]  ;;  %v423_v10 = vld [vmem:[%s2700_s29 + $0x4c8] sm:$0xff] }
  0x53   : > { %2313 = vmatprep.subr.bf16.mxu0 %v509_v43  ;;  %v2553_v11 = vld [vmem:[%s3534_s1 + $0x68] ss:$40 sps:$4 sm:$0xff]   ;;  %v2554_v12 = vld [vmem:[%s3534_s1 + $0xb4] ss:$40 sps:$4 sm:$0xff]   ;;  %v499_v14 = vpack.c.bf16 %v409_v8, %v408_v6  ;;  %v506_v15 = vpack.c.bf16 %v423_v10, %v422_v9  ;;  %v406_v16 = vld [vmem:[%s2700_s29 + $0x440] sm:$0xff] }
  0x54   : > { %2264 = vmatpush3.bf16.msra.mxu1 %v478_v29  ;;  %v2557_v13 = vld [vmem:[%s3534_s1 + $0xbc] ss:$40 sps:$4 sm:$0xff]   ;;  %v407_v17 = vld [vmem:[%s2700_s29 + $0x448] sm:$0xff]  ;;  %v420_v18 = vld [vmem:[%s2700_s29 + $0x4b0] sm:$0xff] }
  0x55   : > { %1151 = vmatmul.mubr.bf16.gmra.mxu0 %v2520_v27  ;;  %643 = vperm.xlu0 %2492, %v597_v32   ;;  %v421_v19 = vld [vmem:[%s2700_s29 + $0x4b8] sm:$0xff]  ;;  %v498_v20 = vpack.c.bf16 %v407_v17, %v406_v16  ;;  %v404_v22 = vld [vmem:[%s2700_s29 + $0x430] sm:$0xff]  ;;  %v418_v25 = vld [vmem:[%s2700_s29 + $0x4a0] sm:$0xff] }
  0x56   : > { %1158 = vmatprep.mubr.bf16.mxu0 %v2524_v30  ;;  %628 = vperm.xlu1 %2493, %v594_v33   ;;  %v505_v21 = vpack.c.bf16 %v421_v19, %v420_v18  ;;  %v405_v23 = vld [vmem:[%s2700_s29 + $0x438] sm:$0xff]  ;;  %v419_v26 = vld [vmem:[%s2700_s29 + $0x4a8] sm:$0xff]  ;;  %v402_v32 = vld [vmem:[%s2700_s29 + $0x420] sm:$0xff] }
  0x57   : > { %1248 = vmatmul.mubr.bf16.gmra.mxu1 %v2523_v28  ;;  %v2556_v24 = vld [vmem:[%s3534_s1 + $0xb0] ss:$40 sps:$4 sm:$0xff]   ;;  %v2560_v28 = vld [vmem:[%s3534_s1 + $0x104] ss:$40 sps:$4 sm:$0xff]   ;;  %v497_v30 = vpack.c.bf16 %v405_v23, %v404_v22  ;;  %v2562_v40 = vld [vmem:[%s3534_s1 + $0x100] ss:$40 sps:$4 sm:$0xff]  }
  0x58   : > { %1255 = vmatprep.mubr.bf16.mxu1 %v2527_v31  ;;  %v2559_v27 = vld [vmem:[%s3534_s1 + $0xb8] ss:$40 sps:$4 sm:$0xff]   ;;  %v2563_v29 = vld [vmem:[%s3534_s1 + $0x10c] ss:$40 sps:$4 sm:$0xff]   ;;  %v504_v31 = vpack.c.bf16 %v419_v26, %v418_v25  ;;  %v2565_v43 = vld [vmem:[%s3534_s1 + $0x108] ss:$40 sps:$4 sm:$0xff]  }
  0x59   : > { %633 = vperm.xlu0 %2492, %v595_v35   ;;  %v403_v33 = vld [vmem:[%s2700_s29 + $0x428] sm:$0xff]  ;;  %v417_v35 = vld [vmem:[%s2700_s29 + $0x498] sm:$0xff]  ;;  %v414_v41 = vld [vmem:[%s2700_s29 + $0x480] sm:$0xff] }
  0x5a   : > { %618 = vperm.xlu1 %2493, %v592_v37   ;;  %v2574_v55 = vld [vmem:[%s3534_s1 + $0x1a0] ss:$40 sps:$4 sm:$0xff]   ;;  %v2578_v57 = vld [vmem:[%s3534_s1 + $0x1f4] ss:$40 sps:$4 sm:$0xff]   ;;  %v2580_v59 = vld [vmem:[%s3534_s1 + $0x1f0] ss:$40 sps:$4 sm:$0xff]  }
  0x5b   : > { %v2581_v58 = vld [vmem:[%s3534_s1 + $0x1fc] ss:$40 sps:$4 sm:$0xff]   ;;  %v2586_v63 = vld [vmem:[%s3534_s1 + $0x240] ss:$40 sps:$4 sm:$0xff]   ;;  %v2601_v8 = vld [vmem:[%s3534_s1 + $0x110] ss:$40 sps:$4 sm:$0xff]  }
  0x5c   : > { %v2592_v1 = vld [vmem:[%s3534_s1 + $0x24] ss:$40 sps:$4 sm:$0xff]   ;;  %v2590_v2 = vld [vmem:[%s3534_s1 + $0x20] ss:$40 sps:$4 sm:$0xff]   ;;  %v2593_v3 = vld [vmem:[%s3534_s1 + $0x74] ss:$40 sps:$4 sm:$0xff]  }
  0x5d   : > { %1159 = vmatmul.mubr.bf16.gmra.mxu0 %v2526_v34  ;;  %623 = vperm.xlu0 %2492, %v593_v42   ;;  %v416_v34 = vld [vmem:[%s2700_s29 + $0x490] sm:$0xff]  ;;  %v415_v42 = vld [vmem:[%s2700_s29 + $0x488] sm:$0xff] }
  0x5e   : > { %1166 = vmatprep.mubr.bf16.mxu0 %v2530_v38  ;;  %608 = vperm.xlu1 %2493, %v590_v44   ;;  %v503_v37 = vpack.c.bf16 %v417_v35, %v416_v34  ;;  %v400_v38 = vld [vmem:[%s2700_s29 + $0x410] sm:$0xff]  ;;  %v2598_v6 = vld [vmem:[%s3534_s1 + $0xc0] ss:$40 sps:$4 sm:$0xff]   ;;  %v2602_v9 = vld [vmem:[%s3534_s1 + $0x164] ss:$40 sps:$4 sm:$0xff]  }
  0x5f   : > { %1256 = vmatmul.mubr.bf16.gmra.mxu1 %v2529_v36  ;;  %v496_v36 = vpack.c.bf16 %v403_v33, %v402_v32  ;;  %v2566_v44 = vld [vmem:[%s3534_s1 + $0x154] ss:$40 sps:$4 sm:$0xff]   ;;  %v2607_v16 = vld [vmem:[%s3534_s1 + $0x1b0] ss:$40 sps:$4 sm:$0xff]   ;;  %v2608_v18 = vld [vmem:[%s3534_s1 + $0x204] ss:$40 sps:$4 sm:$0xff]  }
  0x60   : > { %1263 = vmatprep.mubr.bf16.mxu1 %v2533_v39  ;;  %v401_v39 = vld [vmem:[%s2700_s29 + $0x418] sm:$0xff] }
  0x61   : > { %613 = vperm.xlu0 %2492, %v591_v45   ;;  %v2569_v45 = vld [vmem:[%s3534_s1 + $0x15c] ss:$40 sps:$4 sm:$0xff]   ;;  %v2613_v25 = vld [vmem:[%s3534_s1 + $0x250] ss:$40 sps:$4 sm:$0xff]  }
  0x62   : > { %v2611_v22 = vld [vmem:[%s3534_s1 + $0x254] ss:$40 sps:$4 sm:$0xff]  }
  0x65   : > { %1167 = vmatmul.mubr.bf16.gmra.mxu0 %v2532_v46  ;;  %v495_v46 = vpack.c.bf16 %v401_v39, %v400_v38 }
  0x66   : > { %1174 = vmatprep.mubr.bf16.mxu0 %v2536_v48  ;;  %v398_v48 = vld [vmem:[%s2700_s29 + $0x400] sm:$0xff] }
  0x67   : > { %1264 = vmatmul.mubr.bf16.gmra.mxu1 %v2535_v47  ;;  %v502_v47 = vpack.c.bf16 %v415_v42, %v414_v41 }
  0x68   : > { %1271 = vmatprep.mubr.bf16.mxu1 %v2539_v49  ;;  %v399_v49 = vld [vmem:[%s2700_s29 + $0x408] sm:$0xff] }
  0x6d   : > { %1175 = vmatmul.mubr.bf16.gmra.mxu0 %v2538_v50  ;;  %v494_v50 = vpack.c.bf16 %v399_v49, %v398_v48 }
  0x6e   : > { %1312 = vmatprep.mubr.bf16.mxu0 %v2544_v52  ;;  %v2571_v52 = vld [vmem:[%s3534_s1 + $0x158] ss:$40 sps:$4 sm:$0xff]  }
  0x6f   : > { %1272 = vmatmul.mubr.bf16.gmra.mxu1 %v2541_v51  ;;  %v2568_v51 = vld [vmem:[%s3534_s1 + $0x150] ss:$40 sps:$4 sm:$0xff]  }
  0x70   : > { %1409 = vmatprep.mubr.bf16.mxu1 %v2547_v53  ;;  %v2572_v53 = vld [vmem:[%s3534_s1 + $0x1a4] ss:$40 sps:$4 sm:$0xff]  }
  0x75   : > { %1313 = vmatmul.mubr.bf16.vlgmr.msra.gmra.mxu0 %v2542_v54  ;;  %v2575_v54 = vld [vmem:[%s3534_s1 + $0x1ac] ss:$40 sps:$4 sm:$0xff]  }
  0x76   : > { %1320 = vmatprep.mubr.bf16.mxu0 %v2548_v60  ;;  %2314 = vmatpush3.bf16.msra.mxu0 %v501_v62  ;;  %v2583_v60 = vld [vmem:[%s3534_s1 + $0x1f8] ss:$40 sps:$4 sm:$0xff]   ;;  %v2587_v62 = vld [vmem:[%s3534_s1 + $0x24c] ss:$40 sps:$4 sm:$0xff]  }
  0x77   : > { %1410 = vmatmul.mubr.bf16.vlgmr.msra.gmra.mxu1 %v2545_v56  ;;  %2315 = vmatprep.subr.bf16.mxu0 %v508_v0  ;;  %v2577_v56 = vld [vmem:[%s3534_s1 + $0x1a8] ss:$40 sps:$4 sm:$0xff]  }
  0x78   : > { %1417 = vmatprep.mubr.bf16.mxu1 %v2551_v61  ;;  %v2584_v61 = vld [vmem:[%s3534_s1 + $0x244] ss:$40 sps:$4 sm:$0xff]   ;;  %v2589_v0 = vld [vmem:[%s3534_s1 + $0x248] ss:$40 sps:$4 sm:$0xff]  }
  0x7a   : > { %2316 = vmatpush3.bf16.msra.mxu0 %v500_v5  ;;  %v2596_v5 = vld [vmem:[%s3534_s1 + $0xc4] ss:$40 sps:$4 sm:$0xff]  }
  0x7b   : > { %2317 = vmatprep.subr.bf16.mxu0 %v507_v7  ;;  %v2599_v7 = vld [vmem:[%s3534_s1 + $0x114] ss:$40 sps:$4 sm:$0xff]  }
  0x7d   : > { %1321 = vmatmul.mubr.bf16.gmra.mxu0 %v2550_v4  ;;  %v2595_v4 = vld [vmem:[%s3534_s1 + $0x70] ss:$40 sps:$4 sm:$0xff]  }
  0x7e   : > { %1328 = vmatprep.mubr.bf16.mxu0 %v2554_v12  ;;  %2318 = vmatpush3.bf16.msra.mxu0 %v499_v14 }
  0x7f   : > { %1418 = vmatmul.mubr.bf16.gmra.mxu1 %v2553_v11  ;;  %2319 = vmatprep.subr.bf16.mxu0 %v506_v15  ;;  %v2604_v11 = vld [vmem:[%s3534_s1 + $0x160] ss:$40 sps:$4 sm:$0xff]  }
  0x80   : > { %1425 = vmatprep.mubr.bf16.mxu1 %v2557_v13  ;;  %v2605_v13 = vld [vmem:[%s3534_s1 + $0x1b4] ss:$40 sps:$4 sm:$0xff]  }
  0x82   : > { %2320 = vmatpush3.bf16.msra.mxu0 %v498_v20 }
  0x83   : > { %2321 = vmatprep.subr.bf16.mxu0 %v505_v21  ;;  %v2610_v21 = vld [vmem:[%s3534_s1 + $0x200] ss:$40 sps:$4 sm:$0xff]  }
  0x85   : > { %1329 = vmatmul.mubr.bf16.gmra.mxu0 %v2556_v24 }
  0x86   : > { %1336 = vmatprep.mubr.bf16.mxu0 %v2560_v28  ;;  %2322 = vmatpush3.bf16.msra.mxu0 %v497_v30 }
  0x87   : > { %1426 = vmatmul.mubr.bf16.gmra.mxu1 %v2559_v27  ;;  %2323 = vmatprep.subr.bf16.mxu0 %v504_v31 }
  0x88   : > { %1433 = vmatprep.mubr.bf16.mxu1 %v2563_v29 }
  0x8a   : > { %2324 = vmatpush3.bf16.msra.mxu0 %v496_v36 }
  0x8b   : > { %2325 = vmatprep.subr.bf16.mxu0 %v503_v37 }
  0x8d   : > { %1337 = vmatmul.mubr.bf16.gmra.mxu0 %v2562_v40 }
  0x8e   : > { %1344 = vmatprep.mubr.bf16.mxu0 %v2566_v44  ;;  %2326 = vmatpush3.bf16.msra.mxu0 %v495_v46 }
  0x8f   : > { %1434 = vmatmul.mubr.bf16.gmra.mxu1 %v2565_v43  ;;  %2327 = vmatprep.subr.bf16.mxu0 %v502_v47 }
  0x90   : > { %1441 = vmatprep.mubr.bf16.mxu1 %v2569_v45 }
  0x92   : > { %2328 = vmatpush3.bf16.msra.mxu0 %v494_v50 }
  0x95   : > { %1345 = vmatmul.mubr.bf16.gmra.mxu0 %v2568_v51 }
  0x96   : > { %1352 = vmatprep.mubr.bf16.mxu0 %v2572_v53 }
  0x97   : > { %1442 = vmatmul.mubr.bf16.gmra.mxu1 %v2571_v52 }
  0x98   : > { %1449 = vmatprep.mubr.bf16.mxu1 %v2575_v54 }
  0x9d   : > { %1353 = vmatmul.mubr.bf16.gmra.mxu0 %v2574_v55 }
  0x9e   : > { %1360 = vmatprep.mubr.bf16.mxu0 %v2578_v57 }
  0x9f   : > { %1450 = vmatmul.mubr.bf16.gmra.mxu1 %v2577_v56 }
  0xa0   : > { %1457 = vmatprep.mubr.bf16.mxu1 %v2581_v58 }
  0xa5   : > { %1361 = vmatmul.mubr.bf16.gmra.mxu0 %v2580_v59 }
  0xa6   : > { %1368 = vmatprep.mubr.bf16.mxu0 %v2584_v61 }
  0xa7   : > { %1458 = vmatmul.mubr.bf16.gmra.mxu1 %v2583_v60 }
  0xa8   : > { %1465 = vmatprep.mubr.bf16.mxu1 %v2587_v62 }
  0xad   : > { %1369 = vmatmul.mubr.bf16.gmra.mxu0 %v2586_v63 }
  0xae   : > { %1506 = vmatprep.mubr.bf16.mxu0 %v2592_v1  ;;  %v3123_v10 = vpop.permute.xlu1 %673 }
  0xaf   : > { %1466 = vmatmul.mubr.bf16.gmra.mxu1 %v2589_v0 }
  0xb4   : > { %v3128_v12 = vpop.permute.xlu0 %683 }
  0xb5   : > { %1507 = vmatmul.mubr.bf16.vlgmr.msra.gmra.mxu0 %v2590_v2  ;;  %v3133_v14 = vpop.permute.xlu1 %668 }
  0xb6   : > { %1514 = vmatprep.mubr.bf16.mxu0 %v2593_v3 }
  0xbc   : > { %v3135_v15 = vpop.permute.xlu0 %678 }
  0xbd   : > { %1515 = vmatmul.mubr.bf16.gmra.mxu0 %v2595_v4  ;;  %v3140_v17 = vpop.permute.xlu1 %658 }
  0xbe   : > { %1522 = vmatprep.mubr.bf16.mxu0 %v2596_v5 }
  0xc4   : > { %v3145_v19 = vpop.permute.xlu0 %663 }
  0xc5   : > { %1523 = vmatmul.mubr.bf16.gmra.mxu0 %v2598_v6  ;;  %v3147_v20 = vpop.permute.xlu1 %648 }
  0xc6   : > { %1530 = vmatprep.mubr.bf16.mxu0 %v2599_v7 }
  0xcc   : > { %v3155_v23 = vpop.permute.xlu0 %653 }
  0xcd   : > { %1531 = vmatmul.mubr.bf16.gmra.mxu0 %v2601_v8  ;;  %v3157_v24 = vpop.permute.xlu1 %638 }
  0xce   : > { %1538 = vmatprep.mubr.bf16.mxu0 %v2602_v9 }
  0xd0   : > { %v3162_v26 = vpop.permute.xlu0 %643 }
  0xd1   : > { %v629_v27 = vpop.permute.xlu1 %628 }
  0xd4   : > { %v634_v28 = vpop.permute.xlu0 %633 }
  0xd5   : > { %1539 = vmatmul.mubr.bf16.gmra.mxu0 %v2604_v11  ;;  %v619_v29 = vpop.permute.xlu1 %618 }
  0xd6   : > { %1546 = vmatprep.mubr.bf16.mxu0 %v2605_v13 }
  0xd8   : > { %v624_v31 = vpop.permute.xlu0 %623 }
  0xd9   : > { %v609_v34 = vpop.permute.xlu1 %608 }
  0xdc   : > { %v614_v42 = vpop.permute.xlu0 %613 }
  0xdd   : > { %1547 = vmatmul.mubr.bf16.gmra.mxu0 %v2607_v16 }
  0xde   : > { %1554 = vmatprep.mubr.bf16.mxu0 %v2608_v18 }
  0xe5   : > { %1555 = vmatmul.mubr.bf16.gmra.mxu0 %v2610_v21 }
  0xe6   : > { %1562 = vmatprep.mubr.bf16.mxu0 %v2611_v22 }
  0xed   : > { %1563 = vmatmul.mubr.bf16.gmra.mxu0 %v2613_v25 }
  0xf5   : > { %v2073_v30 = vpop.f32.mrf.mxu0 }
  0xf7   : > { %v2137_v32 = vpop.f32.mrf.mxu1  ;;  %v2074_v33 = vpop.f32.mrf.mxu0 }
  0xf8   : > { %v2075_v35 = vadd.f32 %v2074_v33, %v2073_v30 }
  0xf9   : > { %v2138_v36 = vpop.f32.mrf.mxu1  ;;  %v2076_v37 = vpop.f32.mrf.mxu0 }
  0xfa   : > { %v2139_v38 = vadd.f32 %v2138_v36, %v2137_v32  ;;  %v1121_v39 = vadd.f32 %v2075_v35, %v609_v34 }
  0xfb   : > { %v2140_v40 = vpop.f32.mrf.mxu1  ;;  %v2077_v41 = vpop.f32.mrf.mxu0 }
  0xfc   : > { %v3164_v43 = vadd.f32 %v2139_v38, %v1121_v39  ;;  %v2078_v44 = vadd.f32 %v2077_v41, %v2076_v37 }
  0xfd   : > { %v2141_v45 = vpop.f32.mrf.mxu1  ;;  %v2079_v46 = vpop.f32.mrf.mxu0 }
  0xfe   : > { %v2142_v47 = vadd.f32 %v2141_v45, %v2140_v40  ;;  %v1124_v48 = vadd.f32 %v2078_v44, %v614_v42 }
  0xff   : > { %v2143_v49 = vpop.f32.mrf.mxu1  ;;  %v2080_v50 = vpop.f32.mrf.mxu0 }
 0x100   : > { %v3166_v51 = vadd.f32 %v2142_v47, %v1124_v48  ;;  %v2081_v52 = vadd.f32 %v2080_v50, %v2079_v46 }
 0x101   : > { %v2144_v53 = vpop.f32.mrf.mxu1  ;;  %v2082_v54 = vpop.f32.mrf.mxu0 }
 0x102   : > { %v2145_v55 = vadd.f32 %v2144_v53, %v2143_v49  ;;  %v1129_v56 = vadd.f32 %v2081_v52, %v619_v29 }
 0x103   : > { %v2146_v57 = vpop.f32.mrf.mxu1  ;;  %v2083_v58 = vpop.f32.mrf.mxu0 }
 0x104   : > { %v3168_v59 = vadd.f32 %v2145_v55, %v1129_v56  ;;  %v2084_v60 = vadd.f32 %v2083_v58, %v2082_v54 }
 0x105   : > { %v2147_v61 = vpop.f32.mrf.mxu1  ;;  %v2085_v62 = vpop.f32.mrf.mxu0 }
 0x106   : > { %v2148_v63 = vadd.f32 %v2147_v61, %v2146_v57  ;;  %v1132_v0 = vadd.f32 %v2084_v60, %v624_v31 }
 0x107   : > { %v2149_v1 = vpop.f32.mrf.mxu1  ;;  %v2086_v2 = vpop.f32.mrf.mxu0 }
 0x108   : > { %v3170_v3 = vadd.f32 %v2148_v63, %v1132_v0  ;;  %v2087_v4 = vadd.f32 %v2086_v2, %v2085_v62 }
 0x109   : > { %v2150_v5 = vpop.f32.mrf.mxu1  ;;  %v2088_v6 = vpop.f32.mrf.mxu0 }
 0x10a   : > { %v2151_v7 = vadd.f32 %v2150_v5, %v2149_v1  ;;  %v1137_v8 = vadd.f32 %v2087_v4, %v629_v27 }
 0x10b   : > { %v2152_v9 = vpop.f32.mrf.mxu1  ;;  %v2089_v11 = vpop.f32.mrf.mxu0 }
 0x10c   : > { %v3172_v13 = vadd.f32 %v2151_v7, %v1137_v8  ;;  %v2090_v16 = vadd.f32 %v2089_v11, %v2088_v6 }
 0x10d   : > { %v2153_v18 = vpop.f32.mrf.mxu1  ;;  %v2091_v21 = vpop.f32.mrf.mxu0 }
 0x10e   : > { %v2154_v22 = vadd.f32 %v2153_v18, %v2152_v9  ;;  %v1140_v25 = vadd.f32 %v2090_v16, %v634_v28 }
 0x10f   : > { %v2155_v29 = vpop.f32.mrf.mxu1  ;;  %v2092_v30 = vpop.f32.mrf.mxu0 }
 0x110   : > { %v3174_v31 = vadd.f32 %v2154_v22, %v1140_v25  ;;  %v2093_v32 = vadd.f32 %v2092_v30, %v2091_v21 }
 0x111   : > { %v2156_v33 = vpop.f32.mrf.mxu1  ;;  %v2094_v34 = vpop.f32.mrf.mxu0 }
 0x112   : > { %v2157_v35 = vadd.f32 %v2156_v33, %v2155_v29  ;;  %v1145_v36 = vadd.f32 %v2093_v32, %v3157_v24 }
 0x113   : > { %v2158_v27 = vpop.f32.mrf.mxu1  ;;  %v2095_v37 = vpop.f32.mrf.mxu0 }
 0x114   : > { %v3177_v38 = vadd.f32 %v2157_v35, %v1145_v36  ;;  %v2096_v39 = vadd.f32 %v2095_v37, %v2094_v34 }
 0x115   : > { %v2159_v40 = vpop.f32.mrf.mxu1  ;;  %v2097_v41 = vpop.f32.mrf.mxu0 }
 0x116   : > { %v2160_v42 = vadd.f32 %v2159_v40, %v2158_v27  ;;  %v1148_v28 = vadd.f32 %v2096_v39, %v3162_v26 }
 0x117   : > { %v2161_v44 = vpop.f32.mrf.mxu1  ;;  %v2098_v45 = vpop.f32.mrf.mxu0 }
 0x118   : > { %v3180_v46 = vadd.f32 %v2160_v42, %v1148_v28  ;;  %v2099_v47 = vadd.f32 %v2098_v45, %v2097_v41 }
 0x119   : > { %v2162_v48 = vpop.f32.mrf.mxu1  ;;  %v2100_v49 = vpop.f32.mrf.mxu0 }
 0x11a   : > { %v2163_v50 = vadd.f32 %v2162_v48, %v2161_v44  ;;  %v1153_v24 = vadd.f32 %v2099_v47, %v3147_v20 }
 0x11b   : > { %v2164_v52 = vpop.f32.mrf.mxu1  ;;  %v2101_v53 = vpop.f32.mrf.mxu0 }
 0x11c   : > { %v3183_v54 = vadd.f32 %v2163_v50, %v1153_v24  ;;  %v2102_v55 = vadd.f32 %v2101_v53, %v2100_v49 }
 0x11d   : > { %v2165_v56 = vpop.f32.mrf.mxu1  ;;  %v2103_v57 = vpop.f32.mrf.mxu0 }
 0x11e   : > { %v2166_v58 = vadd.f32 %v2165_v56, %v2164_v52  ;;  %v1156_v26 = vadd.f32 %v2102_v55, %v3155_v23 }
 0x11f   : > { %v2167_v60 = vpop.f32.mrf.mxu1  ;;  %v2104_v61 = vpop.f32.mrf.mxu0 }
 0x120   : > { %v3186_v62 = vadd.f32 %v2166_v58, %v1156_v26  ;;  %v2105_v63 = vadd.f32 %v2104_v61, %v2103_v57 }
 0x121   : > { %v2168_v0 = vpop.f32.mrf.mxu1  ;;  %v2106_v1 = vpop.f32.mrf.mxu0 }
 0x122   : > { %v2169_v2 = vadd.f32 %v2168_v0, %v2167_v60  ;;  %v1161_v20 = vadd.f32 %v2105_v63, %v3140_v17 }
 0x123   : > { %v2170_v4 = vpop.f32.mrf.mxu1  ;;  %v2107_v5 = vpop.f32.mrf.mxu0 }
 0x124   : > { %v3189_v6 = vadd.f32 %v2169_v2, %v1161_v20  ;;  %v2108_v7 = vadd.f32 %v2107_v5, %v2106_v1 }
 0x125   : > { %v2171_v8 = vpop.f32.mrf.mxu1  ;;  %v2109_v9 = vpop.f32.mrf.mxu0 }
 0x126   : > { %v2172_v11 = vadd.f32 %v2171_v8, %v2170_v4  ;;  %v1164_v23 = vadd.f32 %v2108_v7, %v3145_v19 }
 0x127   : > { %v2173_v16 = vpop.f32.mrf.mxu1  ;;  %v2110_v18 = vpop.f32.mrf.mxu0 }
 0x128   : > { %v3192_v21 = vadd.f32 %v2172_v11, %v1164_v23  ;;  %v2111_v22 = vadd.f32 %v2110_v18, %v2109_v9 }
 0x129   : > { %v2174_v25 = vpop.f32.mrf.mxu1  ;;  %v2112_v29 = vpop.f32.mrf.mxu0 }
 0x12a   : > { %v2175_v30 = vadd.f32 %v2174_v25, %v2173_v16  ;;  %v1169_v17 = vadd.f32 %v2111_v22, %v3133_v14 }
 0x12b   : > { %v2176_v32 = vpop.f32.mrf.mxu1  ;;  %v2113_v33 = vpop.f32.mrf.mxu0 }
 0x12c   : > { %v3195_v34 = vadd.f32 %v2175_v30, %v1169_v17  ;;  %v2114_v35 = vadd.f32 %v2113_v33, %v2112_v29 }
 0x12d   : > { %v2177_v36 = vpop.f32.mrf.mxu1  ;;  %v2115_v27 = vpop.f32.mrf.mxu0 }
 0x12e   : > { %v2178_v37 = vadd.f32 %v2177_v36, %v2176_v32  ;;  %v1172_v19 = vadd.f32 %v2114_v35, %v3123_v10 }
 0x12f   : > { %v3198_v39 = vpop.f32.mrf.mxu1  ;;  %v2116_v40 = vpop.f32.mrf.mxu0 }
 0x130   : > { %v3200_v41 = vadd.f32 %v2178_v37, %v1172_v19  ;;  %v3202_v42 = vadd.f32 %v2116_v40, %v2115_v27 }
 0x131   : > { %v3204_v28 = vpop.f32.mrf.mxu1  ;;  %v2118_v14 = vpop.f32.mrf.mxu0 }
 0x133   : > { %v3206_v44 = vpop.f32.mrf.mxu1  ;;  %v2119_v45 = vpop.f32.mrf.mxu0 }
 0x134   : > { %v3208_v47 = vadd.f32 %v2119_v45, %v2118_v14 }
 0x135   : > { %v3210_v48 = vpop.f32.mrf.mxu1  ;;  %v2201_v49 = vpop.f32.mrf.mxu0 }
 0x137   : > { %v2265_v50 = vpop.f32.mrf.mxu1  ;;  %v2202_v10 = vpop.f32.mrf.mxu0 }
 0x138   : > { %v2203_v24 = vadd.f32 %v2202_v10, %v2201_v49 }
 0x139   : > { %v2266_v52 = vpop.f32.mrf.mxu1  ;;  %v2204_v53 = vpop.f32.mrf.mxu0 }
 0x13a   : > { %v2267_v55 = vadd.f32 %v2266_v52, %v2265_v50  ;;  %v1315_v56 = vadd.f32 %v2203_v24, %v3164_v43 }
 0x13b   : > { %v2268_v57 = vpop.f32.mrf.mxu1  ;;  %v2205_v58 = vpop.f32.mrf.mxu0 }
 0x13c   : > { %v3213_v26 = vadd.f32 %v2267_v55, %v1315_v56  ;;  %v2206_v60 = vadd.f32 %v2205_v58, %v2204_v53 }
 0x13d   : > { %v2269_v61 = vpop.f32.mrf.mxu1  ;;  %v2207_v63 = vpop.f32.mrf.mxu0 }
 0x13e   : > { %v2270_v0 = vadd.f32 %v2269_v61, %v2268_v57  ;;  %v1318_v1 = vadd.f32 %v2206_v60, %v3166_v51 }
 0x13f   : > { %v2271_v2 = vpop.f32.mrf.mxu1  ;;  %v2208_v20 = vpop.f32.mrf.mxu0 }
 0x140   : > { %v3216_v4 = vadd.f32 %v2270_v0, %v1318_v1  ;;  %v2209_v5 = vadd.f32 %v2208_v20, %v2207_v63  ;;  %v2639_v63 = vmov 0.0  }
 0x141   : > { %v2272_v7 = vpop.f32.mrf.mxu1  ;;  %v2210_v8 = vpop.f32.mrf.mxu0  ;;  %268 = vst.msk [vmem:[#allocation2 + $0x70] sm:$0xff] %vm253_vm0, %v2639_v63  ;;  %254 = vst.msk [vmem:[#allocation2] sm:$0xff] %vm253_vm0, %v2639_v63 }
 0x142   : > { %v2273_v9 = vadd.f32 %v2272_v7, %v2271_v2  ;;  %v1323_v43 = vadd.f32 %v2209_v5, %v3168_v59  ;;  %255 = vst.msk [vmem:[#allocation2 + $0x8] sm:$0xff] %vm253_vm0, %v2639_v63  ;;  %256 = vst.msk [vmem:[#allocation2 + $0x10] sm:$0xff] %vm253_vm0, %v2639_v63 }
 0x143   : > { %v2274_v11 = vpop.f32.mrf.mxu1  ;;  %v2211_v23 = vpop.f32.mrf.mxu0  ;;  %257 = vst.msk [vmem:[#allocation2 + $0x18] sm:$0xff] %vm253_vm0, %v2639_v63  ;;  %258 = vst.msk [vmem:[#allocation2 + $0x20] sm:$0xff] %vm253_vm0, %v2639_v63 }
 0x144   : > { %v3219_v16 = vadd.f32 %v2273_v9, %v1323_v43  ;;  %v2212_v18 = vadd.f32 %v2211_v23, %v2210_v8  ;;  %259 = vst.msk [vmem:[#allocation2 + $0x28] sm:$0xff] %vm253_vm0, %v2639_v63  ;;  %260 = vst.msk [vmem:[#allocation2 + $0x30] sm:$0xff] %vm253_vm0, %v2639_v63 }
 0x145   : > { %v2275_v22 = vpop.f32.mrf.mxu1  ;;  %v2213_v25 = vpop.f32.mrf.mxu0  ;;  %261 = vst.msk [vmem:[#allocation2 + $0x38] sm:$0xff] %vm253_vm0, %v2639_v63  ;;  %262 = vst.msk [vmem:[#allocation2 + $0x40] sm:$0xff] %vm253_vm0, %v2639_v63 }
 0x146   : > { %v2276_v29 = vadd.f32 %v2275_v22, %v2274_v11  ;;  %v1326_v51 = vadd.f32 %v2212_v18, %v3170_v3  ;;  %263 = vst.msk [vmem:[#allocation2 + $0x48] sm:$0xff] %vm253_vm0, %v2639_v63  ;;  %264 = vst.msk [vmem:[#allocation2 + $0x50] sm:$0xff] %vm253_vm0, %v2639_v63 }
 0x147   : > { %v2277_v30 = vpop.f32.mrf.mxu1  ;;  %v2214_v17 = vpop.f32.mrf.mxu0  ;;  %265 = vst.msk [vmem:[#allocation2 + $0x58] sm:$0xff] %vm253_vm0, %v2639_v63  ;;  %266 = vst.msk [vmem:[#allocation2 + $0x60] sm:$0xff] %vm253_vm0, %v2639_v63 }
 0x148   : > { %v3222_v32 = vadd.f32 %v2276_v29, %v1326_v51  ;;  %v2215_v33 = vadd.f32 %v2214_v17, %v2213_v25  ;;  %267 = vst.msk [vmem:[#allocation2 + $0x68] sm:$0xff] %vm253_vm0, %v2639_v63  ;;  %269 = vst.msk [vmem:[#allocation2 + $0x78] sm:$0xff] %vm253_vm0, %v2639_v63 }
 0x149   : > { %v2278_v35 = vpop.f32.mrf.mxu1  ;;  %v2216_v36 = vpop.f32.mrf.mxu0 }
 0x14a   : > { %v2279_v27 = vadd.f32 %v2278_v35, %v2277_v30  ;;  %v1331_v59 = vadd.f32 %v2215_v33, %v3172_v13 }
 0x14b   : > { %v2217_v37 = vpop.f32.mrf.mxu0  ;;  %v3236_v57 = vpop.f32.mrf.mxu1 }
 0x14c   : > { %v3225_v19 = vadd.f32 %v2279_v27, %v1331_v59  ;;  %v2218_v40 = vadd.f32 %v2217_v37, %v2216_v36 }
 0x14d   : > { %v2219_v14 = vpop.f32.mrf.mxu0 }
 0x14e   : > { %v3228_v45 = vadd.f32 %v2218_v40, %v3174_v31 }
 0x14f   : > { %v2220_v49 = vpop.f32.mrf.mxu0 }
 0x150   : > { %v2221_v3 = vadd.f32 %v2220_v49, %v2219_v14 }
 0x151   : > { %v2222_v50 = vpop.f32.mrf.mxu0 }
 0x152   : > { %v3231_v10 = vadd.f32 %v2221_v3, %v3177_v38  ;;  %v3257_v38 = vpop.f32.mrf.mxu1 }
 0x153   : > { %v2223_v24 = vpop.f32.mrf.mxu0 }
 0x154   : > { %3539 = vst [vmem:[#allocation3_spill] sm:$0xff] %v3231_v10  ;;  %v2224_v52 = vadd.f32 %v2223_v24, %v2222_v50  ;;  %v3262_v2 = vpop.f32.mrf.mxu1  ;;  %v2184_v10 = vadd.f32 %v3210_v48, %v3206_v44 }
 0x155   : > { %v2225_v53 = vpop.f32.mrf.mxu0  ;;  %3541 = vst [vmem:[#allocation5_spill] sm:$0xff] %v3262_v2 }
 0x156   : > { %v3234_v55 = vadd.f32 %v2224_v52, %v3180_v46  ;;  %v3267_v9 = vpop.f32.mrf.mxu1 }
 0x157   : > { %v2226_v13 = vpop.f32.mrf.mxu0  ;;  %3542 = vst [vmem:[#allocation6_spill] sm:$0xff] %v3267_v9 }
 0x158   : > { %v2227_v56 = vadd.f32 %v2226_v13, %v2225_v53 }
 0x159   : > { %v2228_v58 = vpop.f32.mrf.mxu0 }
 0x15a   : > { %v3239_v31 = vadd.f32 %v2227_v56, %v3183_v54 }
 0x15b   : > { %v2229_v60 = vpop.f32.mrf.mxu0 }
 0x15c   : > { %3540 = vst [vmem:[#allocation4_spill] sm:$0xff] %v3239_v31  ;;  %v2230_v61 = vadd.f32 %v2229_v60, %v2228_v58 }
 0x15d   : > { %v2231_v46 = vpop.f32.mrf.mxu0 }
 0x15e   : > { %v3260_v54 = vadd.f32 %v2230_v61, %v3186_v62  ;;  %v3272_v62 = vpop.f32.mrf.mxu1 }
 0x15f   : > { %v2232_v0 = vpop.f32.mrf.mxu0 }
 0x160   : > { %v2233_v1 = vadd.f32 %v2232_v0, %v2231_v46 }
 0x161   : > { %v2234_v20 = vpop.f32.mrf.mxu0 }
 0x162   : > { %v3265_v5 = vadd.f32 %v2233_v1, %v3189_v6  ;;  %v3277_v6 = vpop.f32.mrf.mxu1 }
 0x163   : > { %v2235_v7 = vpop.f32.mrf.mxu0 }
 0x164   : > { %v2236_v8 = vadd.f32 %v2235_v7, %v2234_v20  ;;  %v3282_v35 = vpop.f32.mrf.mxu1 }
 0x165   : > { %v2237_v43 = vpop.f32.mrf.mxu0 }
 0x166   : > { %v3270_v11 = vadd.f32 %v2236_v8, %v3192_v21  ;;  %v3286_v27 = vpop.f32.mrf.mxu1 }
 0x167   : > { %v2238_v23 = vpop.f32.mrf.mxu0 }
 0x168   : > { %v2239_v18 = vadd.f32 %v2238_v23, %v2237_v43  ;;  %v2292_v40 = vpop.f32.mrf.mxu1 }
 0x169   : > { %v2240_v22 = vpop.f32.mrf.mxu0 }
 0x16a   : > { %v3275_v25 = vadd.f32 %v2239_v18, %v3195_v34 }
 0x16b   : > { %v2241_v29 = vpop.f32.mrf.mxu0 }
 0x16c   : > { %v2242_v51 = vadd.f32 %v2241_v29, %v2240_v22 }
 0x16d   : > { %v2243_v30 = vpop.f32.mrf.mxu0 }
 0x16e   : > { %v3280_v17 = vadd.f32 %v2242_v51, %v3200_v41  ;;  %v2293_v41 = vpop.f32.mrf.mxu1 }
 0x16f   : > { %v2244_v33 = vpop.f32.mrf.mxu0 }
 0x170   : > { %v3294_v56 = vpop.f32.mrf.mxu1 }
 0x171   : > { %v3284_v21 = vpop.f32.mrf.mxu0 }
 0x172   : > { %v3299_v46 = vpop.f32.mrf.mxu1 }
 0x173   : > { %v2247_v36 = vpop.f32.mrf.mxu0 }
 0x175   : > { %v2329_v59 = vpop.f32.mrf.mxu0 }
 0x177   : > { %v2330_v37 = vpop.f32.mrf.mxu0 }
 0x178   : > { %v2331_v34 = vadd.f32 %v2330_v37, %v2329_v59 }
 0x179   : > { %v2332_v14 = vpop.f32.mrf.mxu0 }
 0x17a   : > { %v3289_v49 = vadd.f32 %v2331_v34, %v3213_v26 }
 0x17b   : > { %v2333_v3 = vpop.f32.mrf.mxu0 }
 0x17c   : > { %3543 = vst [vmem:[#allocation7_spill] sm:$0xff] %v3289_v49  ;;  %v2334_v50 = vadd.f32 %v2333_v3, %v2332_v14  ;;  %v2245_v49 = vadd.f32 %v2244_v33, %v2243_v30  ;;  %v2294_v30 = vadd.f32 %v2293_v41, %v2292_v40 }
 0x17d   : > { %v2335_v24 = vpop.f32.mrf.mxu0 }
 0x17e   : > { %v3292_v52 = vadd.f32 %v2334_v50, %v3216_v4  ;;  %v2298_v4 = vpop.f32.mrf.mxu1 }
 0x17f   : > { %v2336_v53 = vpop.f32.mrf.mxu0 }
 0x180   : > { %3544 = vst [vmem:[#allocation8_spill] sm:$0xff] %v3292_v52  ;;  %v2337_v13 = vadd.f32 %v2336_v53, %v2335_v24 }
 0x181   : > { %v2338_v58 = vpop.f32.mrf.mxu0 }
 0x182   : > { %v3297_v60 = vadd.f32 %v2337_v13, %v3219_v16  ;;  %v2299_v16 = vpop.f32.mrf.mxu1 }
 0x183   : > { %v2339_v61 = vpop.f32.mrf.mxu0 }
 0x184   : > { %3545 = vst [vmem:[#allocation9_spill] sm:$0xff] %v3297_v60  ;;  %v2340_v63 = vadd.f32 %v2339_v61, %v2338_v58  ;;  %v2301_v22 = vpop.f32.mrf.mxu1 }
 0x185   : > { %v2341_v26 = vpop.f32.mrf.mxu0 }
 0x186   : > { %v3302_v0 = vadd.f32 %v2340_v63, %v3222_v32  ;;  %v2302_v32 = vpop.f32.mrf.mxu1 }
 0x187   : > { %v2342_v1 = vpop.f32.mrf.mxu0 }
 0x188   : > { %3546 = vst [vmem:[#allocation10_spill] sm:$0xff] %v3302_v0  ;;  %v2343_v20 = vadd.f32 %v2342_v1, %v2341_v26  ;;  %v2304_v34 = vpop.f32.mrf.mxu1  ;;  %v1177_v26 = vadd.f32 %v3202_v42, %v3135_v15  ;;  %v2181_v1 = vadd.f32 %v3204_v28, %v3198_v39  ;;  %v1180_v0 = vadd.f32 %v3208_v47, %v3128_v12 }
 0x189   : > { %v3304_v7 = vpop.f32.mrf.mxu0  ;;  %v2248_v15 = vadd.f32 %v2247_v36, %v3284_v21  ;;  %v2288_v21 = vadd.f32 %v3277_v6, %v3272_v62  ;;  %v2303_v36 = vadd.f32 %v2302_v32, %v2301_v22  ;;  %v2282_v62 = vadd.f32 %v3257_v38, %v3236_v57 }
 0x18a   : > { %v3307_v8 = vadd.f32 %v2343_v20, %v3225_v19  ;;  %v2305_v19 = vpop.f32.mrf.mxu1  ;;  %v1274_v52 = vadd.f32 %v2181_v1, %v1177_v26  ;;  %v1277_v39 = vadd.f32 %v2184_v10, %v1180_v0  ;;  %v1447_v10 = vadd.f32 %v2294_v30, %v3260_v54  ;;  %v3559_v30 = vld [vmem:[#allocation3_spill] sm:$0xff] }
 0x18b   : > { %v3309_v43 = vpop.f32.mrf.mxu0  ;;  %v2306_v26 = vadd.f32 %v2305_v19, %v2304_v34  ;;  %v1439_v54 = vadd.f32 %v2288_v21, %v3234_v55  ;;  %v2297_v6 = vadd.f32 %v3299_v46, %v3294_v56  ;;  %v1431_v55 = vadd.f32 %v2282_v62, %v3228_v45  ;;  %v3554_v45 = vld [vmem:[#allocation5_spill] sm:$0xff]  ;;  %v3561_v21 = vld [vmem:[#allocation8_spill] sm:$0xff] }
 0x18c   : > { %3547 = vst [vmem:[#allocation11_spill] sm:$0xff] %v3307_v8  ;;  %v2307_v53 = vpop.f32.mrf.mxu1  ;;  %v1371_v31 = vadd.f32 %v2245_v49, %v1274_v52  ;;  %v1374_v12 = vadd.f32 %v2248_v15, %v1277_v39 }
 0x18d   : > { %v3311_v23 = vpop.f32.mrf.mxu0  ;;  %v1452_v56 = vadd.f32 %v2297_v6, %v3265_v5  ;;  %v1602_v6 = vld [vmem:[#allocation2 + $0x78] sm:$0xff] }
 0x18e   : > { %3548 = vst [vmem:[#allocation12_spill] sm:$0xff] %v3311_v23  ;;  %v2308_v61 = vpop.f32.mrf.mxu1 }
 0x18f   : > { %v3313_v18 = vpop.f32.mrf.mxu0  ;;  %v2309_v9 = vadd.f32 %v2308_v61, %v2307_v53  ;;  %v3556_v61 = vld [vmem:[#allocation4_spill] sm:$0xff] }
 0x190   : > { %3549 = vst [vmem:[#allocation13_spill] sm:$0xff] %v3313_v18  ;;  %v2310_v60 = vpop.f32.mrf.mxu1  ;;  %v2300_v18 = vadd.f32 %v2299_v16, %v2298_v4 }
 0x191   : > { %v2350_v29 = vpop.f32.mrf.mxu0 }
 0x192   : > { %v2311_v42 = vpop.f32.mrf.mxu1  ;;  %v1455_v33 = vadd.f32 %v2300_v18, %v3270_v11  ;;  %v1463_v11 = vadd.f32 %v2306_v26, %v3280_v17  ;;  %v1460_v17 = vadd.f32 %v2303_v36, %v3275_v25  ;;  %v2291_v25 = vadd.f32 %v3286_v27, %v3282_v35  ;;  %v3560_v26 = vld [vmem:[#allocation10_spill] sm:$0xff] }
 0x193   : > { %v2351_v51 = vpop.f32.mrf.mxu0  ;;  %v2312_v47 = vadd.f32 %v2311_v42, %v2310_v60 }
 0x194   : > { %v1444_v35 = vadd.f32 %v2291_v25, %v3556_v61  ;;  %v1599_v25 = vld [vmem:[#allocation2 + $0x60] sm:$0xff] }
 0x195   : > { %v3315_v59 = vpop.f32.mrf.mxu0  ;;  %v1471_v41 = vadd.f32 %v2312_v47, %v1374_v12  ;;  %v3557_v27 = vld [vmem:[#allocation12_spill] sm:$0xff] }
 0x196   : > { %3550 = vst [vmem:[#allocation14_spill] sm:$0xff] %v3315_v59 }
 0x197   : > { %v3317_v37 = vpop.f32.mrf.mxu0  ;;  %v3558_v5 = vld [vmem:[#allocation13_spill] sm:$0xff] }
 0x198   : > { %3551 = vst [vmem:[#allocation15_spill] sm:$0xff] %v3317_v37  ;;  %v1468_v37 = vadd.f32 %v2309_v9, %v1371_v31  ;;  %v2352_v9 = vadd.f32 %v2351_v51, %v2350_v29  ;;  %v2346_v29 = vadd.f32 %v3309_v43, %v3304_v7 }
 0x199   : > { %v2356_v14 = vpop.f32.mrf.mxu0 }
 0x19a   : > { %v1536_v51 = vadd.f32 %v2352_v9, %v1439_v54  ;;  %v1528_v46 = vadd.f32 %v2346_v29, %v1431_v55 }
 0x19b   : > { %v2357_v3 = vpop.f32.mrf.mxu0 }
 0x19c   : > { %v2358_v44 = vadd.f32 %v2357_v3, %v2356_v14  ;;  %v1578_v3 = vmax.f32 %v1536_v51, 0.0 }
 0x19d   : > { %v2359_v50 = vpop.f32.mrf.mxu0  ;;  %v3552_v7 = vld [vmem:[#allocation14_spill] sm:$0xff] }
 0x19e   : > { %v1544_v60 = vadd.f32 %v2358_v44, %v1447_v10  ;;  %v1625_v39 = vsel %vm1603_vm1, %v1578_v3, 0.0  ;;  %v1572_v10 = vmax.f32 %v3561_v21, 0.0  ;;  %v1589_v21 = vld [vmem:[#allocation2 + $0x10] sm:$0xff] }
 0x19f   : > { %v2360_v24 = vpop.f32.mrf.mxu0  ;;  %v3553_v43 = vld [vmem:[#allocation15_spill] sm:$0xff] }
 0x1a0   : > { %v2361_v32 = vadd.f32 %v2360_v24, %v2359_v50  ;;  %v2355_v14 = vadd.f32 %v3553_v43, %v3552_v7 }
 0x1a1   : > { %v2362_v13 = vpop.f32.mrf.mxu0 }
 0x1a2   : > { %v1549_v19 = vadd.f32 %v2361_v32, %v1452_v56  ;;  %v1541_v15 = vadd.f32 %v2355_v14, %v1444_v35  ;;  %v1594_v56 = vld [vmem:[#allocation2 + $0x38] sm:$0xff]  ;;  %v1595_v35 = vld [vmem:[#allocation2 + $0x40] sm:$0xff] }
 0x1a3   : > { %v2363_v58 = vpop.f32.mrf.mxu0 }
 0x1a4   : > { %v2364_v28 = vadd.f32 %v2363_v58, %v2362_v13  ;;  %v3555_v13 = vld [vmem:[#allocation6_spill] sm:$0xff] }
 0x1a5   : > { %v2365_v63 = vpop.f32.mrf.mxu0  ;;  %v2285_v58 = vadd.f32 %v3555_v13, %v3554_v45 }
 0x1a6   : > { %v1552_v4 = vadd.f32 %v2364_v28, %v1455_v33  ;;  %v1581_v28 = vmax.f32 %v1549_v19, 0.0  ;;  %v1597_v19 = vld [vmem:[#allocation2 + $0x50] sm:$0xff] }
 0x1a7   : > { %v2366_v20 = vpop.f32.mrf.mxu0  ;;  %v1436_v33 = vadd.f32 %v2285_v58, %v3559_v30 }
 0x1a8   : > { %v1634_v47 = vsel %vm1603_vm1, %v1581_v28, 0.0  ;;  %v1588_v28 = vld [vmem:[#allocation2 + $0x8] sm:$0xff] }
 0x1a9   : > { %v2368_v8 = vpop.f32.mrf.mxu0 }
 0x1ab   : > { %v2369_v23 = vpop.f32.mrf.mxu0 }
 0x1ac   : > { %v2370_v49 = vadd.f32 %v2369_v23, %v2368_v8  ;;  %v1582_v23 = vmax.f32 %v1552_v4, 0.0 }
 0x1ad   : > { %v2371_v2 = vpop.f32.mrf.mxu0 }
 0x1ae   : > { %v1560_v16 = vadd.f32 %v2370_v49, %v1463_v11  ;;  %v1637_v57 = vsel %vm1603_vm1, %v1582_v23, 0.0  ;;  %v3562_v11 = vld [vmem:[#allocation11_spill] sm:$0xff]  ;;  %v1601_v23 = vld [vmem:[#allocation2 + $0x70] sm:$0xff] }
 0x1af   : > { %v2372_v1 = vpop.f32.mrf.mxu0 }
 0x1b0   : > { %v2373_v59 = vadd.f32 %v2372_v1, %v2371_v2  ;;  %v2367_v2 = vadd.f32 %v2366_v20, %v2365_v63  ;;  %v1584_v38 = vmax.f32 %v1560_v16, 0.0  ;;  %v2349_v63 = vadd.f32 %v3558_v5, %v3557_v27  ;;  %v1590_v27 = vld [vmem:[#allocation2 + $0x18] sm:$0xff] }
 0x1b1   : > { %v2374_v48 = vpop.f32.mrf.mxu0  ;;  %v1576_v20 = vmax.f32 %v1528_v46, 0.0  ;;  %v1574_v1 = vmax.f32 %v3560_v26, 0.0 }
 0x1b2   : > { %v1565_v52 = vadd.f32 %v2373_v59, %v1468_v37  ;;  %v1580_v59 = vmax.f32 %v1544_v60, 0.0  ;;  %v1557_v37 = vadd.f32 %v2367_v2, %v1460_v17  ;;  %v1643_v50 = vsel %vm1603_vm1, %v1584_v38, 0.0  ;;  %v3564_v2 = vld [vmem:[#allocation7_spill] sm:$0xff]  ;;  %v1598_v17 = vld [vmem:[#allocation2 + $0x58] sm:$0xff] }
 0x1b3   : > { %v2375_v40 = vpop.f32.mrf.mxu0  ;;  %v1533_v12 = vadd.f32 %v2349_v63, %v1436_v33  ;;  %v1619_v44 = vsel %vm1603_vm1, %v1576_v20, 0.0  ;;  %v1613_v49 = vsel %vm1603_vm1, %v1574_v1, 0.0  ;;  %v1571_v16 = vmax.f32 %v3564_v2, 0.0 }
 0x1b4   : > { %v2376_v0 = vadd.f32 %v2375_v40, %v2374_v48  ;;  %v1585_v31 = vmax.f32 %v1565_v52, 0.0  ;;  %v1631_v24 = vsel %vm1603_vm1, %v1580_v59, 0.0  ;;  %v1583_v53 = vmax.f32 %v1557_v37, 0.0  ;;  %v1600_v59 = vld [vmem:[#allocation2 + $0x68] sm:$0xff] }
 0x1b5   : > { %v1579_v48 = vmax.f32 %v1541_v15, 0.0  ;;  %v1577_v52 = vmax.f32 %v1533_v12, 0.0  ;;  %v1607_v40 = vsel %vm1603_vm1, %v1572_v10, 0.0  ;;  %v1596_v37 = vld [vmem:[#allocation2 + $0x48] sm:$0xff] }
 0x1b6   : > { %v1568_v18 = vadd.f32 %v2376_v0, %v1471_v41  ;;  %v1646_v8 = vsel %vm1603_vm1, %v1585_v31, 0.0  ;;  %v1640_v42 = vsel %vm1603_vm1, %v1583_v53, 0.0  ;;  %v1575_v41 = vmax.f32 %v3562_v11, 0.0  ;;  %v3563_v31 = vld [vmem:[#allocation9_spill] sm:$0xff] }
 0x1b7   : > { %1647 = vadd.xlane.f32.xlu1 %v1646_v8  ;;  %v1628_v4 = vsel %vm1603_vm1, %v1579_v48, 0.0  ;;  %v1622_v36 = vsel %vm1603_vm1, %v1577_v52, 0.0  ;;  %v1573_v9 = vmax.f32 %v3563_v31, 0.0  ;;  %v1688_v8 = vld [vmem:[%s3536_s3] sm:$0xff] }
 0x1b8   : > { %v1586_v22 = vmax.f32 %v1568_v18, 0.0  ;;  %v1616_v0 = vsel %vm1603_vm1, %v1575_v41, 0.0  ;;  %v1604_v18 = vsel %vm1603_vm1, %v1571_v16, 0.0  ;;  %2441 = vmatprep.mubr.f32.mxu1 %v1688_v8  ;;  %v1587_v41 = vld [vmem:[#allocation2] sm:$0xff] }
 0x1b9   : > { %v1610_v60 = vsel %vm1603_vm1, %v1573_v9, 0.0 }
 0x1ba   : > { %v1649_v34 = vsel %vm1603_vm1, %v1586_v22, 0.0 }
 0x1bb   : > { %1650 = vadd.xlane.f32.xlu0 %v1649_v34  ;;  %1638 = vadd.xlane.f32.xlu1 %v1637_v57 }
 0x1bf   : > { %1644 = vadd.xlane.f32.xlu0 %v1643_v50  ;;  %1632 = vadd.xlane.f32.xlu1 %v1631_v24  ;;  %v1592_v50 = vld [vmem:[#allocation2 + $0x28] sm:$0xff] }
 0x1c3   : > { %1641 = vadd.xlane.f32.xlu0 %v1640_v42  ;;  %1626 = vadd.xlane.f32.xlu1 %v1625_v39  ;;  %v1593_v39 = vld [vmem:[#allocation2 + $0x30] sm:$0xff] }
 0x1c7   : > { %1635 = vadd.xlane.f32.xlu0 %v1634_v47  ;;  %1620 = vadd.xlane.f32.xlu1 %v1619_v44  ;;  %v1591_v44 = vld [vmem:[#allocation2 + $0x20] sm:$0xff] }
 0x1cb   : > { %1629 = vadd.xlane.f32.xlu0 %v1628_v4  ;;  %1614 = vadd.xlane.f32.xlu1 %v1613_v49 }
 0x1cf   : > { %1623 = vadd.xlane.f32.xlu0 %v1622_v36  ;;  %1608 = vadd.xlane.f32.xlu1 %v1607_v40 }
 0x1d3   : > { %1617 = vadd.xlane.f32.xlu0 %v1616_v0 }
 0x1d7   : > { %1611 = vadd.xlane.f32.xlu0 %v1610_v60 }
 0x1db   : > { %1605 = vadd.xlane.f32.xlu0 %v1604_v18 }
 0x240   : > { %v1648_v62 = vpop.xlane.xlu1 %1647 }
 0x241   : > { %v1666_v54 = vadd.f32 %v1648_v62, %v1601_v23  ;;  %v1689_v23 = vld [vmem:[%s3536_s3 + $0x8] sm:$0xff]  ;;  %v1690_v62 = vld [vmem:[%s3536_s3 + $0x10] sm:$0xff] }
 0x243   : > { %1683 = vst.msk [vmem:[#allocation2 + $0x70] sm:$0xff] %vm253_vm0, %v1666_v54  ;;  %v1691_v54 = vld [vmem:[%s3536_s3 + $0x18] sm:$0xff] }
 0x244   : > { %v1651_v22 = vpop.xlane.xlu0 %1650  ;;  %v1639_v29 = vpop.xlane.xlu1 %1638 }
 0x245   : > { %v1667_v51 = vadd.f32 %v1651_v22, %v1602_v6  ;;  %v1663_v32 = vadd.f32 %v1639_v29, %v1598_v17  ;;  %v1692_v6 = vld [vmem:[%s3536_s3 + $0x20] sm:$0xff]  ;;  %v1693_v17 = vld [vmem:[%s3536_s3 + $0x28] sm:$0xff]  ;;  %v1694_v22 = vld [vmem:[%s3536_s3 + $0x30] sm:$0xff] }
 0x246   : > { %v1695_v29 = vld [vmem:[%s3536_s3 + $0x38] sm:$0xff] }
 0x247   : > { %1684 = vst.msk [vmem:[#allocation2 + $0x78] sm:$0xff] %vm253_vm0, %v1667_v51  ;;  %1680 = vst.msk [vmem:[#allocation2 + $0x58] sm:$0xff] %vm253_vm0, %v1663_v32  ;;  %v1696_v51 = vld [vmem:[%s3536_s3 + $0x40] sm:$0xff]  ;;  %v1697_v32 = vld [vmem:[%s3536_s3 + $0x48] sm:$0xff] }
 0x248   : > { %v1645_v34 = vpop.xlane.xlu0 %1644  ;;  %v1633_v57 = vpop.xlane.xlu1 %1632 }
 0x249   : > { %v1665_v38 = vadd.f32 %v1645_v34, %v1600_v59  ;;  %v1661_v55 = vadd.f32 %v1633_v57, %v1596_v37  ;;  %v1698_v59 = vld [vmem:[%s3536_s3 + $0x50] sm:$0xff]  ;;  %v1699_v37 = vld [vmem:[%s3536_s3 + $0x58] sm:$0xff]  ;;  %v1700_v34 = vld [vmem:[%s3536_s3 + $0x60] sm:$0xff] }
 0x24a   : > { %v1718_v45 = vld [vmem:[#allocation2 + $0x70] sm:$0xff]  ;;  %v1701_v57 = vld [vmem:[%s3536_s3 + $0x68] sm:$0xff] }
 0x24b   : > { %1682 = vst.msk [vmem:[#allocation2 + $0x68] sm:$0xff] %vm253_vm0, %v1665_v38  ;;  %1678 = vst.msk [vmem:[#allocation2 + $0x48] sm:$0xff] %vm253_vm0, %v1661_v55  ;;  %v1702_v38 = vld [vmem:[%s3536_s3 + $0x70] sm:$0xff]  ;;  %v1703_v55 = vld [vmem:[%s3536_s3 + $0x78] sm:$0xff] }
 0x24c   : > { %v1642_v46 = vpop.xlane.xlu0 %1641  ;;  %v1627_v7 = vpop.xlane.xlu1 %1626 }
 0x24d   : > { %v1664_v43 = vadd.f32 %v1642_v46, %v1599_v25  ;;  %v1659_v14 = vadd.f32 %v1627_v7, %v1594_v56  ;;  %v1721_v25 = vld [vmem:[%s3537_s4 + $0x8] sm:$0xff]  ;;  %v1720_v46 = vld [vmem:[%s3537_s4] sm:$0xff] }
 0x24e   : > { %v1719_v3 = vld [vmem:[#allocation2 + $0x78] sm:$0xff] }
 0x24f   : > { %1681 = vst.msk [vmem:[#allocation2 + $0x60] sm:$0xff] %vm253_vm0, %v1664_v43  ;;  %1676 = vst.msk [vmem:[#allocation2 + $0x38] sm:$0xff] %vm253_vm0, %v1659_v14  ;;  %2409 = vmatprep.subr.mxu1 %v1719_v3  ;;  %v1715_v26 = vld [vmem:[#allocation2 + $0x58] sm:$0xff] }
 0x250   : > { %2410 = vmatpush3.msra.mxu1 %v1719_v3  ;;  %v1636_v24 = vpop.xlane.xlu0 %1635  ;;  %v1621_v53 = vpop.xlane.xlu1 %1620  ;;  %v1723_v14 = vld [vmem:[%s3537_s4 + $0x18] sm:$0xff] }
 0x251   : > { %v1662_v13 = vadd.f32 %v1636_v24, %v1597_v19  ;;  %v1657_v58 = vadd.f32 %v1621_v53, %v1592_v50  ;;  %2411 = vmatprep.subr.mxu1 %v1718_v45  ;;  %v1722_v50 = vld [vmem:[%s3537_s4 + $0x10] sm:$0xff] }
 0x252   : > { %2412 = vmatpush3.msra.mxu1 %v1718_v45  ;;  %v1717_v61 = vld [vmem:[#allocation2 + $0x68] sm:$0xff] }
 0x253   : > { %1679 = vst.msk [vmem:[#allocation2 + $0x50] sm:$0xff] %vm253_vm0, %v1662_v13  ;;  %1674 = vst.msk [vmem:[#allocation2 + $0x28] sm:$0xff] %vm253_vm0, %v1657_v58  ;;  %2413 = vmatprep.subr.mxu1 %v1717_v61  ;;  %v1713_v4 = vld [vmem:[#allocation2 + $0x48] sm:$0xff] }
 0x254   : > { %2414 = vmatpush3.msra.mxu1 %v1717_v61  ;;  %v1630_v5 = vpop.xlane.xlu0 %1629  ;;  %v1615_v63 = vpop.xlane.xlu1 %1614  ;;  %v1725_v45 = vld [vmem:[%s3537_s4 + $0x28] sm:$0xff]  ;;  %v1724_v61 = vld [vmem:[%s3537_s4 + $0x20] sm:$0xff] }
 0x255   : > { %v1660_v20 = vadd.f32 %v1630_v5, %v1595_v35  ;;  %v1655_v15 = vadd.f32 %v1615_v63, %v1590_v27  ;;  %v1727_v5 = vld [vmem:[%s3537_s4 + $0x38] sm:$0xff] }
 0x256   : > { %v1716_v42 = vld [vmem:[#allocation2 + $0x60] sm:$0xff]  ;;  %v1711_v36 = vld [vmem:[#allocation2 + $0x38] sm:$0xff] }
 0x257   : > { %1677 = vst.msk [vmem:[#allocation2 + $0x40] sm:$0xff] %vm253_vm0, %v1660_v20  ;;  %1672 = vst.msk [vmem:[#allocation2 + $0x18] sm:$0xff] %vm253_vm0, %v1655_v15  ;;  %2415 = vmatprep.subr.mxu1 %v1716_v42  ;;  %v1726_v15 = vld [vmem:[%s3537_s4 + $0x30] sm:$0xff] }
 0x258   : > { %2416 = vmatpush3.msra.mxu1 %v1716_v42  ;;  %v1624_v30 = vpop.xlane.xlu0 %1623  ;;  %v1609_v33 = vpop.xlane.xlu1 %1608 }
 0x259   : > { %v1658_v1 = vadd.f32 %v1624_v30, %v1593_v39  ;;  %v1653_v12 = vadd.f32 %v1609_v33, %v1588_v28  ;;  %2417 = vmatprep.subr.mxu1 %v1715_v26  ;;  %v1729_v28 = vld [vmem:[%s3537_s4 + $0x48] sm:$0xff] }
 0x25a   : > { %2418 = vmatpush3.msra.mxu1 %v1715_v26  ;;  %v1714_v47 = vld [vmem:[#allocation2 + $0x50] sm:$0xff]  ;;  %v1709_v31 = vld [vmem:[#allocation2 + $0x28] sm:$0xff]  ;;  %v1728_v26 = vld [vmem:[%s3537_s4 + $0x40] sm:$0xff] }
 0x25b   : > { %1675 = vst.msk [vmem:[#allocation2 + $0x30] sm:$0xff] %vm253_vm0, %v1658_v1  ;;  %1670 = vst.msk [vmem:[#allocation2 + $0x8] sm:$0xff] %vm253_vm0, %v1653_v12  ;;  %2419 = vmatprep.subr.mxu1 %v1714_v47 }
 0x25c   : > { %2420 = vmatpush3.msra.mxu1 %v1714_v47  ;;  %v1618_v48 = vpop.xlane.xlu0 %1617  ;;  %v1731_v47 = vld [vmem:[%s3537_s4 + $0x58] sm:$0xff] }
 0x25d   : > { %v1656_v49 = vadd.f32 %v1618_v48, %v1591_v44  ;;  %2421 = vmatprep.subr.mxu1 %v1713_v4 }
 0x25e   : > { %2422 = vmatpush3.msra.mxu1 %v1713_v4  ;;  %v1712_v52 = vld [vmem:[#allocation2 + $0x40] sm:$0xff]  ;;  %v1707_v2 = vld [vmem:[#allocation2 + $0x18] sm:$0xff]  ;;  %v1730_v4 = vld [vmem:[%s3537_s4 + $0x50] sm:$0xff] }
 0x25f   : > { %1673 = vst.msk [vmem:[#allocation2 + $0x20] sm:$0xff] %vm253_vm0, %v1656_v49  ;;  %2423 = vmatprep.subr.mxu1 %v1712_v52 }
 0x260   : > { %2424 = vmatpush3.msra.mxu1 %v1712_v52  ;;  %v1612_v10 = vpop.xlane.xlu0 %1611 }
 0x261   : > { %v1654_v40 = vadd.f32 %v1612_v10, %v1589_v21  ;;  %2425 = vmatprep.subr.mxu1 %v1711_v36  ;;  %v1733_v21 = vld [vmem:[%s3537_s4 + $0x68] sm:$0xff] }
 0x262   : > { %2426 = vmatpush3.msra.mxu1 %v1711_v36  ;;  %v1710_v11 = vld [vmem:[#allocation2 + $0x30] sm:$0xff]  ;;  %v1705_v18 = vld [vmem:[#allocation2 + $0x8] sm:$0xff] }
 0x263   : > { %1671 = vst.msk [vmem:[#allocation2 + $0x10] sm:$0xff] %vm253_vm0, %v1654_v40  ;;  %2427 = vmatprep.subr.mxu1 %v1710_v11  ;;  %v1732_v40 = vld [vmem:[%s3537_s4 + $0x60] sm:$0xff] }
 0x264   : > { %2428 = vmatpush3.msra.mxu1 %v1710_v11  ;;  %v1606_v0 = vpop.xlane.xlu0 %1605 }
 0x265   : > { %v1652_v9 = vadd.f32 %v1606_v0, %v1587_v41  ;;  %2429 = vmatprep.subr.mxu1 %v1709_v31  ;;  %v1735_v0 = vld [vmem:[%s3537_s4 + $0x78] sm:$0xff] }
 0x266   : > { %2430 = vmatpush3.msra.mxu1 %v1709_v31  ;;  %v1708_v60 = vld [vmem:[#allocation2 + $0x20] sm:$0xff] }
 0x267   : > { %1669 = vst.msk [vmem:[#allocation2] sm:$0xff] %vm253_vm0, %v1652_v9  ;;  %2431 = vmatprep.subr.mxu1 %v1708_v60 }
 0x268   : > { %2432 = vmatpush3.msra.mxu1 %v1708_v60  ;;  %v1734_v60 = vld [vmem:[%s3537_s4 + $0x70] sm:$0xff] }
 0x269   : > { %2433 = vmatprep.subr.mxu1 %v1707_v2 }
 0x26a   : > { %2434 = vmatpush3.msra.mxu1 %v1707_v2  ;;  %v1706_v16 = vld [vmem:[#allocation2 + $0x10] sm:$0xff] }
 0x26b   : > { %2435 = vmatprep.subr.mxu1 %v1706_v16 }
 0x26c   : > { %2436 = vmatpush3.msra.mxu1 %v1706_v16 }
 0x26d   : > { %2437 = vmatprep.subr.mxu1 %v1705_v18 }
 0x26e   : > { %2438 = vmatpush3.msra.mxu1 %v1705_v18  ;;  %v1704_v8 = vld [vmem:[#allocation2] sm:$0xff] }
 0x26f   : > { %2439 = vmatprep.subr.mxu1 %v1704_v8 }
 0x270   : > { %2440 = vmatpush3.msra.mxu1 %v1704_v8 }
 0x271   : > { %2442 = vmatmul.mubr.f32.vlgmr.msra.gmra.mxu1 %v1689_v23 }
 0x272   : > { %2444 = vmatprep.mubr.f32.mxu1 %v1690_v62 }
 0x275   : > { %2445 = vmatmul.mubr.f32.gmra.mxu1 %v1691_v54 }
 0x276   : > { %2447 = vmatprep.mubr.f32.mxu1 %v1692_v6 }
 0x279   : > { %2448 = vmatmul.mubr.f32.gmra.mxu1 %v1693_v17 }
 0x27a   : > { %2450 = vmatprep.mubr.f32.mxu1 %v1694_v22 }
 0x27d   : > { %2451 = vmatmul.mubr.f32.gmra.mxu1 %v1695_v29 }
 0x27e   : > { %2453 = vmatprep.mubr.f32.mxu1 %v1696_v51 }
 0x281   : > { %2454 = vmatmul.mubr.f32.gmra.mxu1 %v1697_v32 }
 0x282   : > { %2456 = vmatprep.mubr.f32.mxu1 %v1698_v59 }
 0x285   : > { %2457 = vmatmul.mubr.f32.gmra.mxu1 %v1699_v37 }
 0x286   : > { %2459 = vmatprep.mubr.f32.mxu1 %v1700_v34 }
 0x289   : > { %2460 = vmatmul.mubr.f32.gmra.mxu1 %v1701_v57 }
 0x28a   : > { %2462 = vmatprep.mubr.f32.mxu1 %v1702_v38 }
 0x28d   : > { %2463 = vmatmul.mubr.f32.gmra.mxu1 %v1703_v55 }
 0x331   : > { %v2443_v56 = vpop.f32.mrf.mxu1 }
 0x332   : > { %v1808_v7 = vadd.f32 %v2443_v56, %v1721_v25 }
 0x333   : > { %v1802_v43 = vpop.f32.mrf.mxu1 }
 0x334   : > { %1882 = vst.msk [vmem:[%s3445_s30 + $0x8] sm:$0xff] %vm253_vm0, %v1808_v7  ;;  %v1803_v3 = vadd.f32 %v1802_v43, %v1720_v46 }
 0x335   : > { %v2446_v19 = vpop.f32.mrf.mxu1 }
 0x336   : > { %1881 = vst.msk [vmem:[%s3445_s30] sm:$0xff] %vm253_vm0, %v1803_v3  ;;  %v1818_v24 = vadd.f32 %v2446_v19, %v1723_v14 }
 0x337   : > { %v1812_v53 = vpop.f32.mrf.mxu1 }
 0x338   : > { %1884 = vst.msk [vmem:[%s3445_s30 + $0x18] sm:$0xff] %vm253_vm0, %v1818_v24  ;;  %v1813_v13 = vadd.f32 %v1812_v53, %v1722_v50 }
 0x339   : > { %v2449_v58 = vpop.f32.mrf.mxu1 }
 0x33a   : > { %1883 = vst.msk [vmem:[%s3445_s30 + $0x10] sm:$0xff] %vm253_vm0, %v1813_v13  ;;  %v1828_v35 = vadd.f32 %v2449_v58, %v1725_v45 }
 0x33b   : > { %v1822_v27 = vpop.f32.mrf.mxu1 }
 0x33c   : > { %1886 = vst.msk [vmem:[%s3445_s30 + $0x28] sm:$0xff] %vm253_vm0, %v1828_v35  ;;  %v1823_v63 = vadd.f32 %v1822_v27, %v1724_v61 }
 0x33d   : > { %v2452_v20 = vpop.f32.mrf.mxu1 }
 0x33e   : > { %1885 = vst.msk [vmem:[%s3445_s30 + $0x20] sm:$0xff] %vm253_vm0, %v1823_v63  ;;  %v1838_v42 = vadd.f32 %v2452_v20, %v1727_v5 }
 0x33f   : > { %v1832_v39 = vpop.f32.mrf.mxu1 }
 0x340   : > { %1888 = vst.msk [vmem:[%s3445_s30 + $0x38] sm:$0xff] %vm253_vm0, %v1838_v42  ;;  %v1833_v30 = vadd.f32 %v1832_v39, %v1726_v15 }
 0x341   : > { %v2455_v33 = vpop.f32.mrf.mxu1 }
 0x342   : > { %1887 = vst.msk [vmem:[%s3445_s30 + $0x30] sm:$0xff] %vm253_vm0, %v1833_v30  ;;  %v1848_v1 = vadd.f32 %v2455_v33, %v1729_v28 }
 0x343   : > { %v1842_v12 = vpop.f32.mrf.mxu1 }
 0x344   : > { %1890 = vst.msk [vmem:[%s3445_s30 + $0x48] sm:$0xff] %vm253_vm0, %v1848_v1  ;;  %v1843_v44 = vadd.f32 %v1842_v12, %v1728_v26 }
 0x345   : > { %v2458_v48 = vpop.f32.mrf.mxu1 }
 0x346   : > { %1889 = vst.msk [vmem:[%s3445_s30 + $0x40] sm:$0xff] %vm253_vm0, %v1843_v44  ;;  %v1858_v49 = vadd.f32 %v2458_v48, %v1731_v47 }
 0x347   : > { %v1852_v52 = vpop.f32.mrf.mxu1 }
 0x348   : > { %1892 = vst.msk [vmem:[%s3445_s30 + $0x58] sm:$0xff] %vm253_vm0, %v1858_v49  ;;  %v1853_v10 = vadd.f32 %v1852_v52, %v1730_v4 }
 0x349   : > { %v2461_v36 = vpop.f32.mrf.mxu1 }
 0x34a   : > { %1891 = vst.msk [vmem:[%s3445_s30 + $0x50] sm:$0xff] %vm253_vm0, %v1853_v10  ;;  %v1868_v11 = vadd.f32 %v2461_v36, %v1733_v21 }
 0x34b   : > { %v1862_v41 = vpop.f32.mrf.mxu1 }
 0x34c   : > { %1894 = vst.msk [vmem:[%s3445_s30 + $0x68] sm:$0xff] %vm253_vm0, %v1868_v11  ;;  %v1863_v31 = vadd.f32 %v1862_v41, %v1732_v40 }
 0x34d   : > { %v2464_v9 = vpop.f32.mrf.mxu1 }
 0x34e   : > { %1893 = vst.msk [vmem:[%s3445_s30 + $0x60] sm:$0xff] %vm253_vm0, %v1863_v31  ;;  %v1878_v2 = vadd.f32 %v2464_v9, %v1735_v0 }
 0x34f   : > { %v1872_v16 = vpop.f32.mrf.mxu1 }
 0x350   : > { %1896 = vst.msk [vmem:[%s3445_s30 + $0x78] sm:$0xff] %vm253_vm0, %v1878_v2  ;;  %v1873_v18 = vadd.f32 %v1872_v16, %v1734_v60 }
 0x352   : > { %1895 = vst.msk [vmem:[%s3445_s30 + $0x70] sm:$0xff] %vm253_vm0, %v1873_v18 }
 0x353 PF: > { %s15_s20 = sadd.s32 1, %s2636_s20   ;;  %s3565_s18 = smov %s2632_s19 }
 0x354   : > { %p12_p5 = scmp.ge.s32.totalorder %s15_s20, 4   ;;  %s3566_s19 = smov %s3568_s21 }
 0x356   :  { %14 = sbr.rel (!%p12_p5) target bundleno = 2 (0x2), region = 78 }

</bundles_post_ra>
